<compile_context>
chip_gen: v5e
topology: v5e:2x2
jax: 0.10.0
libtpu: 0.0.40
codegen_flags: <defaults>
</compile_context>

<pallas_src>
import functools

import jax
import jax.numpy as jnp
from jax.experimental import pallas as pl
from jax.experimental.pallas import tpu as pltpu


# ---------------------------------------------------------------------------
# Fused kernel: one batch per grid step
# ---------------------------------------------------------------------------
def _ciim_kernel(H, W, C, Cq,
                 x2_ref, x3_ref,
                 wqkv_ref, bqkv_ref, gam_ref,
                 w3cat_ref, sc2_ref, sh2_ref, sc3_ref, sh3_ref,
                 w1cat_ref, b1sum_ref, wo_ref, bo_ref,
                 out_ref,
                 pad_ref):
    HW = H * W
    bf16 = jnp.bfloat16
    f32 = jnp.float32

    x2 = x2_ref[0]                     # (HW, C) f32
    x3 = x3_ref[0]                     # (HW, C) f32
    xs = x2 + x3                       # x_sum
    xm = x2 * x3                       # x_mul

    # ---- fused 1x1 projections: one MXU weight push for q / k / v2 / v3 ----
    lhs = jnp.concatenate([xs, xm, x2, x3], axis=0).astype(bf16)      # (4HW, C)
    proj = jnp.dot(lhs, wqkv_ref[...], preferred_element_type=f32)    # (4HW, 2Cq+2C)
    b = bqkv_ref[...]                                                 # (1, 2Cq+2C)
    q = proj[0 * HW:1 * HW, 0:Cq] + b[:, 0:Cq]
    k = proj[1 * HW:2 * HW, Cq:2 * Cq] + b[:, Cq:2 * Cq]
    v2 = proj[2 * HW:3 * HW, 2 * Cq:2 * Cq + C] + b[:, 2 * Cq:2 * Cq + C]
    v3 = proj[3 * HW:4 * HW, 2 * Cq + C:] + b[:, 2 * Cq + C:]

    # ---- cross-attention: energy = Q K^T, softmax, out = attn @ [V2|V3] ----
    energy = jax.lax.dot_general(q.astype(bf16), k.astype(bf16),
                                 (((1,), (1,)), ((), ())),
                                 preferred_element_type=f32)          # (HW, HW)
    energy = energy - jnp.max(energy, axis=-1, keepdims=True)
    p = jnp.exp(energy)
    attn = p * pl.reciprocal(jnp.sum(p, axis=-1, keepdims=True), approx=True)

    vcat = jnp.concatenate([v2, v3], axis=1).astype(bf16)             # (HW, 2C)
    o = jnp.dot(attn.astype(bf16), vcat, preferred_element_type=f32)  # (HW, 2C)

    g2 = gam_ref[0, 0]                 # SMEM scalars
    g3 = gam_ref[0, 1]
    y2 = g2 * o[:, :C] + x2            # gamma_2 * out_2 + x2
    y3 = g3 * o[:, C:] + x3            # gamma_3 * out_3 + x3

    # ---- 3x3 SAME conv via im2col (pad in-kernel into VMEM scratch) ----
    def im2col(y_flat):
        pad_ref[...] = jnp.zeros_like(pad_ref)                 # zero border
        pad_ref[1:H + 1, 1:W + 1, :] = y_flat.reshape(H, W, C)
        taps = [pad_ref[dy:dy + H, dx:dx + W, :].reshape(HW, C)
                for dy in range(3) for dx in range(3)]
        return jnp.concatenate(taps, axis=1)                   # (HW, 9C) f32

    p2 = im2col(y2)
    p3 = im2col(y3)
    conv_lhs = jnp.concatenate([p2, p3], axis=0).astype(bf16)         # (2HW, 9C)
    conv = jnp.dot(conv_lhs, w3cat_ref[...], preferred_element_type=f32)  # (2HW, 2C)
    c2 = conv[:HW, :C]
    c3 = conv[HW:, C:]

    # eval-mode BatchNorm (folded to scale/shift) + ReLU, per branch
    r2 = jnp.maximum(c2 * sc2_ref[...] + sh2_ref[...], 0.0)
    r3 = jnp.maximum(c3 * sc3_ref[...] + sh3_ref[...], 0.0)
    # TODO(synk): Dropout2d(0.1) is identity in inference mode (not sampled).

    # fused [1x1 conv branch2 + 1x1 conv branch3 + sum]  (exact algebra)
    s = jnp.dot(jnp.concatenate([r2, r3], axis=1).astype(bf16),
                w1cat_ref[...], preferred_element_type=f32) + b1sum_ref[...]

    # final 1x1 conv
    out = jnp.dot(s.astype(bf16), wo_ref[...], preferred_element_type=f32) + bo_ref[...]
    out_ref[0] = out


# ---------------------------------------------------------------------------
# Wrapper (glue: NCHW<->NHWC transposes, weight fusion/casting — layout only)
# ---------------------------------------------------------------------------
def ciim_forward(x2_nchw, x3_nchw, P):
    B, C, H, W = x2_nchw.shape
    HW = H * W
    Cq = C // 2
    f32, bf16 = jnp.float32, jnp.bfloat16

    x2 = jnp.transpose(x2_nchw, (0, 2, 3, 1)).reshape(B, HW, C)
    x3 = jnp.transpose(x3_nchw, (0, 2, 3, 1)).reshape(B, HW, C)

    # Fused / pre-cast parameters (pure parameter-layout prep, no activations).
    wqkv = jnp.concatenate([P['wq'], P['wk'], P['wv2'], P['wv3']], axis=1).astype(bf16)
    bqkv = jnp.concatenate([P['bq'], P['bk'], P['bv2'], P['bv3']], axis=1).astype(f32)
    gam = jnp.concatenate([P['g2'], P['g3']], axis=1).astype(f32)       # (1, 2)
    w3cat = jnp.concatenate([P['w3_2'].reshape(9 * C, C),
                             P['w3_3'].reshape(9 * C, C)], axis=1).astype(bf16)
    w1cat = jnp.concatenate([P['w1_2'], P['w1_3']], axis=0).astype(bf16)
    b1sum = (P['b1_2'] + P['b1_3']).astype(f32)
    wo = P['wo'].astype(bf16)

    def full(shape):
        return pl.BlockSpec(shape, lambda b, n=len(shape): (0,) * n)

    row = pl.BlockSpec((1, HW, C), lambda b: (b, 0, 0))
    smem = pl.BlockSpec(memory_space=pltpu.MemorySpace.SMEM)

    out_f = pl.pallas_call(
        functools.partial(_ciim_kernel, H, W, C, Cq),
        out_shape=jax.ShapeDtypeStruct((B, HW, C), f32),
        grid=(B,),
        in_specs=[row, row,
                  full((C, 2 * Cq + 2 * C)), full((1, 2 * Cq + 2 * C)), smem,
                  full((9 * C, 2 * C)),
                  full((1, C)), full((1, C)), full((1, C)), full((1, C)),
                  full((2 * C, C)), full((1, C)),
                  full((C, C)), full((1, C))],
        out_specs=row,
        scratch_shapes=[pltpu.VMEM((H + 2, W + 2, C), f32)],
        compiler_params=pltpu.CompilerParams(dimension_semantics=("parallel",)),
    )(x2, x3, wqkv, bqkv, gam,
      w3cat, P['sc2'], P['sh2'], P['sc3'], P['sh3'],
      w1cat, b1sum, wo, P['bo'])

    return jnp.transpose(out_f.reshape(B, H, W, C), (0, 3, 1, 2))


# ---------------------------------------------------------------------------
# Pure-JAX reference.  mxu_dtype=bfloat16 mirrors the kernel's MXU operand
# precision (f32 accumulation); mxu_dtype=float32 is the exact-math baseline.
# ---------------------------------------------------------------------------
def ciim_reference(x2_nchw, x3_nchw, P, mxu_dtype=jnp.float32):
    hp = jax.lax.Precision.HIGHEST
    c = lambda t: t.astype(mxu_dtype).astype(jnp.float32)   # operand rounding only
    B, C, H, W = x2_nchw.shape
    HW = H * W
    x2f = jnp.transpose(x2_nchw, (0, 2, 3, 1)).reshape(B, HW, C)
    x3f = jnp.transpose(x3_nchw, (0, 2, 3, 1)).reshape(B, HW, C)
    xs, xm = x2f + x3f, x2f * x3f
    mm = lambda a, w: jnp.einsum('bic,cd->bid', c(a), c(w), precision=hp)
    q = mm(xs, P['wq']) + P['bq']
    k = mm(xm, P['wk']) + P['bk']
    v2 = mm(x2f, P['wv2']) + P['bv2']
    v3 = mm(x3f, P['wv3']) + P['bv3']
    energy = jnp.einsum('bic,bjc->bij', c(q), c(k), precision=hp)
    attn = jax.nn.softmax(energy, axis=-1)
    o2 = P['g2'][0, 0] * jnp.einsum('bij,bjc->bic', c(attn), c(v2), precision=hp) + x2f
    o3 = P['g3'][0, 0] * jnp.einsum('bij,bjc->bic', c(attn), c(v3), precision=hp) + x3f

    def branch(y, w3, sc, sh, w1, b1):
        yn = y.reshape(B, H, W, C)
        conv = jax.lax.conv_general_dilated(
            c(yn), c(w3), (1, 1), 'SAME',
            dimension_numbers=('NHWC', 'HWIO', 'NHWC'), precision=hp)
        z = jnp.maximum(conv * sc + sh, 0.0)
        return jnp.einsum('bhwc,cd->bhwd', c(z), c(w1), precision=hp) + b1

    z2 = branch(o2, P['w3_2'], P['sc2'], P['sh2'], P['w1_2'], P['b1_2'])
    z3 = branch(o3, P['w3_3'], P['sc3'], P['sh3'], P['w1_3'], P['b1_3'])
    out = jnp.einsum('bhwc,cd->bhwd', c(z2 + z3), c(P['wo']), precision=hp) + P['bo']
    return jnp.transpose(out, (0, 3, 1, 2))


# ---------------------------------------------------------------------------
# Deterministic parameter init (shapes follow the module __init__, channel=C)
# ---------------------------------------------------------------------------
def init_params(key, C):
    Cq = C // 2
    ks = jax.random.split(key, 22)
    w = lambda k, shape, s=0.1: s * jax.random.normal(k, shape, jnp.float32)
    eps = 1e-5

    def bn_fold(k):  # eval-mode BatchNorm folded into per-channel scale/shift
        kg, kb, km, kv = jax.random.split(k, 4)
        gamma = 1.0 + 0.1 * jax.random.normal(kg, (1, C), jnp.float32)
        beta = 0.1 * jax.random.normal(kb, (1, C), jnp.float32)
        mean = 0.1 * jax.random.normal(km, (1, C), jnp.float32)
        var = jnp.abs(1.0 + 0.1 * jax.random.normal(kv, (1, C), jnp.float32))
        scale = gamma / jnp.sqrt(var + eps)
        shift = beta - mean * scale
        return scale, shift

    sc2, sh2 = bn_fold(ks[20])
    sc3, sh3 = bn_fold(ks[21])
    return dict(
        wq=w(ks[0], (C, Cq)), bq=w(ks[1], (1, Cq)),
        wk=w(ks[2], (C, Cq)), bk=w(ks[3], (1, Cq)),
        wv2=w(ks[4], (C, C)), bv2=w(ks[5], (1, C)),
        wv3=w(ks[6], (C, C)), bv3=w(ks[7], (1, C)),
        # gamma_2/gamma_3 are zero-initialized in the module; use deterministic
        # non-zero values so the attention path is actually exercised.
        g2=jnp.full((1, 1), 0.3, jnp.float32),
        g3=jnp.full((1, 1), 0.7, jnp.float32),
        w3_2=w(ks[8], (3, 3, C, C)), w1_2=w(ks[9], (C, C)), b1_2=w(ks[10], (1, C)),
        w3_3=w(ks[11], (3, 3, C, C)), w1_3=w(ks[12], (C, C)), b1_3=w(ks[13], (1, C)),
        wo=w(ks[14], (C, C)), bo=w(ks[15], (1, C)),
        sc2=sc2, sh2=sh2, sc3=sc3, sh3=sh3,
    )


if __name__ == "__main__":
    key = jax.random.PRNGKey(0)
    B, C, H, W = 2, 32, 8, 8          # channel=32 is the module default
    k_x2, k_x3, k_p = jax.random.split(key, 3)
    x2 = jax.random.normal(k_x2, (B, C, H, W), jnp.float32)
    x3 = jax.random.normal(k_x3, (B, C, H, W), jnp.float32)
    P = init_params(k_p, C)

    out = jax.block_until_ready(ciim_forward(x2, x3, P))
    ref_mx = jax.block_until_ready(ciim_reference(x2, x3, P, mxu_dtype=jnp.bfloat16))
    ref_fp = jax.block_until_ready(ciim_reference(x2, x3, P, mxu_dtype=jnp.float32))

    assert out.shape == (B, C, H, W), out.shape
    err_mx = float(jnp.max(jnp.abs(out - ref_mx)))
    err_fp = float(jnp.max(jnp.abs(out - ref_fp)))
    # Structural correctness: compare against a reference with the same bf16
    # MXU-operand precision (tight).
    assert jnp.allclose(out, ref_mx, rtol=2e-2, atol=2e-2), \
        f"bf16-matched max abs err = {err_mx}"
    # Precision sanity bound vs. full-f32 math (bf16 operand rounding only).
    assert jnp.allclose(out, ref_fp, rtol=1e-1, atol=1e-1), \
        f"f32-reference max abs err = {err_fp}"
    print("KERNEL_OK")
</pallas_src>

<mosaic_0001>
module attributes {stable_mosaic.version = 11 : i64} {
  func.func @_ciim_kernel(%arg0: i32, %arg1: memref<1x64x32xf32, #tpu.memory_space<vmem>>, %arg2: memref<1x64x32xf32, #tpu.memory_space<vmem>>, %arg3: memref<32x96xbf16, #tpu.memory_space<vmem>>, %arg4: memref<1x96xf32, #tpu.memory_space<vmem>>, %arg5: memref<1x2xf32, #tpu.memory_space<smem>>, %arg6: memref<288x64xbf16, #tpu.memory_space<vmem>>, %arg7: memref<1x32xf32, #tpu.memory_space<vmem>>, %arg8: memref<1x32xf32, #tpu.memory_space<vmem>>, %arg9: memref<1x32xf32, #tpu.memory_space<vmem>>, %arg10: memref<1x32xf32, #tpu.memory_space<vmem>>, %arg11: memref<64x32xbf16, #tpu.memory_space<vmem>>, %arg12: memref<1x32xf32, #tpu.memory_space<vmem>>, %arg13: memref<32x32xbf16, #tpu.memory_space<vmem>>, %arg14: memref<1x32xf32, #tpu.memory_space<vmem>>, %arg15: memref<1x64x32xf32, #tpu.memory_space<vmem>>, %arg16: memref<10x10x32xf32, #tpu.memory_space<vmem>>) attributes {dimension_semantics = [#tpu.dimension_semantics<parallel>], iteration_bounds = array<i64: 2>, scalar_prefetch = 0 : i64, scratch_operands = 1 : i64, tpu.core_type = #tpu.core_type<tc>, window_params = [{transform_indices = @transform_0, window_bounds = array<i64: 1, 64, 32>}, {transform_indices = @transform_1, window_bounds = array<i64: 1, 64, 32>}, {pipeline_mode = #tpu.pipeline_mode<synchronous>, transform_indices = @transform_2, window_bounds = array<i64: 32, 96>}, {pipeline_mode = #tpu.pipeline_mode<synchronous>, transform_indices = @transform_3, window_bounds = array<i64: 1, 96>}, {transform_indices = @transform_4, window_bounds = array<i64: 1, 2>}, {pipeline_mode = #tpu.pipeline_mode<synchronous>, transform_indices = @transform_5, window_bounds = array<i64: 288, 64>}, {pipeline_mode = #tpu.pipeline_mode<synchronous>, transform_indices = @transform_6, window_bounds = array<i64: 1, 32>}, {pipeline_mode = #tpu.pipeline_mode<synchronous>, transform_indices = @transform_7, window_bounds = array<i64: 1, 32>}, {pipeline_mode = #tpu.pipeline_mode<synchronous>, transform_indices = @transform_8, window_bounds = array<i64: 1, 32>}, {pipeline_mode = #tpu.pipeline_mode<synchronous>, transform_indices = @transform_9, window_bounds = array<i64: 1, 32>}, {pipeline_mode = #tpu.pipeline_mode<synchronous>, transform_indices = @transform_10, window_bounds = array<i64: 64, 32>}, {pipeline_mode = #tpu.pipeline_mode<synchronous>, transform_indices = @transform_11, window_bounds = array<i64: 1, 32>}, {pipeline_mode = #tpu.pipeline_mode<synchronous>, transform_indices = @transform_12, window_bounds = array<i64: 32, 32>}, {pipeline_mode = #tpu.pipeline_mode<synchronous>, transform_indices = @transform_13, window_bounds = array<i64: 1, 32>}, {transform_indices = @transform_14, window_bounds = array<i64: 1, 64, 32>}]} {
    %c0 = arith.constant 0 : index
    %c0_0 = arith.constant 0 : index
    %c0_1 = arith.constant 0 : index
    %0 = vector.load %arg1[%c0, %c0_0, %c0_1] : memref<1x64x32xf32, #tpu.memory_space<vmem>>, vector<1x64x32xf32>
    %1 = vector.shape_cast %0 : vector<1x64x32xf32> to vector<64x32xf32>
    %c0_2 = arith.constant 0 : index
    %c0_3 = arith.constant 0 : index
    %c0_4 = arith.constant 0 : index
    %2 = vector.load %arg2[%c0_2, %c0_3, %c0_4] : memref<1x64x32xf32, #tpu.memory_space<vmem>>, vector<1x64x32xf32>
    %3 = vector.shape_cast %2 : vector<1x64x32xf32> to vector<64x32xf32>
    %4 = arith.addf %1, %3 : vector<64x32xf32>
    %5 = arith.mulf %1, %3 : vector<64x32xf32>
    %6 = tpu.concatenate %4, %5, %1, %3 in 0 : vector<64x32xf32>, vector<64x32xf32>, vector<64x32xf32>, vector<64x32xf32> -> vector<256x32xf32>
    %7 = arith.truncf %6 : vector<256x32xf32> to vector<256x32xbf16>
    %c0_5 = arith.constant 0 : index
    %c0_6 = arith.constant 0 : index
    %8 = vector.load %arg3[%c0_5, %c0_6] : memref<32x96xbf16, #tpu.memory_space<vmem>>, vector<32x96xbf16>
    %cst = arith.constant dense<0.000000e+00> : vector<256x96xf32>
    %9 = tpu.matmul %7, %8, %cst {dimension_numbers = #tpu.dot_dimension_numbers<[1], [0], [0], [1], [0, 0, 1, 1], [], []>} : vector<256x32xbf16>, vector<32x96xbf16>, vector<256x96xf32> -> vector<256x96xf32>
    %c0_7 = arith.constant 0 : index
    %c0_8 = arith.constant 0 : index
    %10 = vector.load %arg4[%c0_7, %c0_8] : memref<1x96xf32, #tpu.memory_space<vmem>>, vector<1x96xf32>
    %11 = vector.extract_strided_slice %9 {offsets = [0, 0], sizes = [64, 16], strides = [1, 1]} : vector<256x96xf32> to vector<64x16xf32>
    %12 = vector.extract_strided_slice %10 {offsets = [0, 0], sizes = [1, 16], strides = [1, 1]} : vector<1x96xf32> to vector<1x16xf32>
    %13 = vector.broadcast %12 : vector<1x16xf32> to vector<64x16xf32>
    %14 = arith.addf %11, %13 : vector<64x16xf32>
    %15 = vector.extract_strided_slice %9 {offsets = [64, 16], sizes = [64, 16], strides = [1, 1]} : vector<256x96xf32> to vector<64x16xf32>
    %16 = vector.extract_strided_slice %10 {offsets = [0, 16], sizes = [1, 16], strides = [1, 1]} : vector<1x96xf32> to vector<1x16xf32>
    %17 = vector.broadcast %16 : vector<1x16xf32> to vector<64x16xf32>
    %18 = arith.addf %15, %17 : vector<64x16xf32>
    %19 = vector.extract_strided_slice %9 {offsets = [128, 32], sizes = [64, 32], strides = [1, 1]} : vector<256x96xf32> to vector<64x32xf32>
    %20 = vector.extract_strided_slice %10 {offsets = [0, 32], sizes = [1, 32], strides = [1, 1]} : vector<1x96xf32> to vector<1x32xf32>
    %21 = vector.broadcast %20 : vector<1x32xf32> to vector<64x32xf32>
    %22 = arith.addf %19, %21 : vector<64x32xf32>
    %23 = vector.extract_strided_slice %9 {offsets = [192, 64], sizes = [64, 32], strides = [1, 1]} : vector<256x96xf32> to vector<64x32xf32>
    %24 = vector.extract_strided_slice %10 {offsets = [0, 64], sizes = [1, 32], strides = [1, 1]} : vector<1x96xf32> to vector<1x32xf32>
    %25 = vector.broadcast %24 : vector<1x32xf32> to vector<64x32xf32>
    %26 = arith.addf %23, %25 : vector<64x32xf32>
    %27 = arith.truncf %14 : vector<64x16xf32> to vector<64x16xbf16>
    %28 = arith.truncf %18 : vector<64x16xf32> to vector<64x16xbf16>
    %cst_9 = arith.constant dense<0.000000e+00> : vector<64x64xf32>
    %29 = tpu.matmul %27, %28, %cst_9 {dimension_numbers = #tpu.dot_dimension_numbers<[1], [1], [0], [0], [0, 0, 1, 0], [], []>} : vector<64x16xbf16>, vector<64x16xbf16>, vector<64x64xf32> -> vector<64x64xf32>
    %cst_10 = arith.constant dense<0xFF800000> : vector<64xf32>
    %30 = vector.multi_reduction <maximumf>, %29, %cst_10 [1] : vector<64x64xf32> to vector<64xf32>
    %31 = vector.shape_cast %30 : vector<64xf32> to vector<64x1xf32>
    %32 = vector.broadcast %31 : vector<64x1xf32> to vector<64x64xf32>
    %33 = arith.subf %29, %32 : vector<64x64xf32>
    %34 = math.exp %33 : vector<64x64xf32>
    %cst_11 = arith.constant dense<0.000000e+00> : vector<64xf32>
    %35 = vector.multi_reduction <add>, %34, %cst_11 [1] : vector<64x64xf32> to vector<64xf32>
    %36 = vector.shape_cast %35 : vector<64xf32> to vector<64x1xf32>
    %37 = tpu.reciprocal %36 {approx = true} : vector<64x1xf32> -> vector<64x1xf32>
    %38 = vector.broadcast %37 : vector<64x1xf32> to vector<64x64xf32>
    %39 = arith.mulf %34, %38 : vector<64x64xf32>
    %40 = tpu.concatenate %22, %26 in 1 : vector<64x32xf32>, vector<64x32xf32> -> vector<64x64xf32>
    %41 = arith.truncf %40 : vector<64x64xf32> to vector<64x64xbf16>
    %42 = arith.truncf %39 : vector<64x64xf32> to vector<64x64xbf16>
    %cst_12 = arith.constant dense<0.000000e+00> : vector<64x64xf32>
    %43 = tpu.matmul %42, %41, %cst_12 {dimension_numbers = #tpu.dot_dimension_numbers<[1], [0], [0], [1], [0, 0, 1, 1], [], []>} : vector<64x64xbf16>, vector<64x64xbf16>, vector<64x64xf32> -> vector<64x64xf32>
    %c0_13 = arith.constant 0 : index
    %c0_14 = arith.constant 0 : index
    %44 = memref.load %arg5[%c0_13, %c0_14] : memref<1x2xf32, #tpu.memory_space<smem>>
    %c0_15 = arith.constant 0 : index
    %c1 = arith.constant 1 : index
    %45 = memref.load %arg5[%c0_15, %c1] : memref<1x2xf32, #tpu.memory_space<smem>>
    %46 = vector.extract_strided_slice %43 {offsets = [0, 0], sizes = [64, 32], strides = [1, 1]} : vector<64x64xf32> to vector<64x32xf32>
    %47 = vector.broadcast %44 : f32 to vector<64x32xf32>
    %48 = arith.mulf %47, %46 : vector<64x32xf32>
    %49 = arith.addf %48, %1 : vector<64x32xf32>
    %50 = vector.extract_strided_slice %43 {offsets = [0, 32], sizes = [64, 32], strides = [1, 1]} : vector<64x64xf32> to vector<64x32xf32>
    %51 = vector.broadcast %45 : f32 to vector<64x32xf32>
    %52 = arith.mulf %51, %50 : vector<64x32xf32>
    %53 = arith.addf %52, %3 : vector<64x32xf32>
    %cst_16 = arith.constant 0.000000e+00 : f32
    %54 = vector.broadcast %cst_16 : f32 to vector<10x10x32xf32>
    %c0_17 = arith.constant 0 : index
    %c0_18 = arith.constant 0 : index
    %c0_19 = arith.constant 0 : index
    %55 = vector.load %arg16[%c0_17, %c0_18, %c0_19] : memref<10x10x32xf32, #tpu.memory_space<vmem>>, vector<10x10x32xf32>
    tpu.vector_store %arg16[%c0_17, %c0_18, %c0_19], %54 {strides = array<i32>} : memref<10x10x32xf32, #tpu.memory_space<vmem>>, vector<10x10x32xf32>,
    %56 = vector.shape_cast %49 : vector<64x32xf32> to vector<8x8x32xf32>
    %c1_20 = arith.constant 1 : index
    %c1_21 = arith.constant 1 : index
    %c0_22 = arith.constant 0 : index
    %57 = vector.load %arg16[%c1_20, %c1_21, %c0_22] : memref<10x10x32xf32, #tpu.memory_space<vmem>>, vector<8x8x32xf32>
    tpu.vector_store %arg16[%c1_20, %c1_21, %c0_22], %56 {strides = array<i32>} : memref<10x10x32xf32, #tpu.memory_space<vmem>>, vector<8x8x32xf32>,
    %c0_23 = arith.constant 0 : index
    %c0_24 = arith.constant 0 : index
    %c0_25 = arith.constant 0 : index
    %58 = vector.load %arg16[%c0_23, %c0_24, %c0_25] : memref<10x10x32xf32, #tpu.memory_space<vmem>>, vector<8x8x32xf32>
    %59 = vector.shape_cast %58 : vector<8x8x32xf32> to vector<64x32xf32>
    %c0_26 = arith.constant 0 : index
    %c1_27 = arith.constant 1 : index
    %c0_28 = arith.constant 0 : index
    %60 = vector.load %arg16[%c0_26, %c1_27, %c0_28] : memref<10x10x32xf32, #tpu.memory_space<vmem>>, vector<8x8x32xf32>
    %61 = vector.shape_cast %60 : vector<8x8x32xf32> to vector<64x32xf32>
    %c0_29 = arith.constant 0 : index
    %c2 = arith.constant 2 : index
    %c0_30 = arith.constant 0 : index
    %62 = vector.load %arg16[%c0_29, %c2, %c0_30] : memref<10x10x32xf32, #tpu.memory_space<vmem>>, vector<8x8x32xf32>
    %63 = vector.shape_cast %62 : vector<8x8x32xf32> to vector<64x32xf32>
    %c1_31 = arith.constant 1 : index
    %c0_32 = arith.constant 0 : index
    %c0_33 = arith.constant 0 : index
    %64 = vector.load %arg16[%c1_31, %c0_32, %c0_33] : memref<10x10x32xf32, #tpu.memory_space<vmem>>, vector<8x8x32xf32>
    %65 = vector.shape_cast %64 : vector<8x8x32xf32> to vector<64x32xf32>
    %c1_34 = arith.constant 1 : index
    %c1_35 = arith.constant 1 : index
    %c0_36 = arith.constant 0 : index
    %66 = vector.load %arg16[%c1_34, %c1_35, %c0_36] : memref<10x10x32xf32, #tpu.memory_space<vmem>>, vector<8x8x32xf32>
    %67 = vector.shape_cast %66 : vector<8x8x32xf32> to vector<64x32xf32>
    %c1_37 = arith.constant 1 : index
    %c2_38 = arith.constant 2 : index
    %c0_39 = arith.constant 0 : index
    %68 = vector.load %arg16[%c1_37, %c2_38, %c0_39] : memref<10x10x32xf32, #tpu.memory_space<vmem>>, vector<8x8x32xf32>
    %69 = vector.shape_cast %68 : vector<8x8x32xf32> to vector<64x32xf32>
    %c2_40 = arith.constant 2 : index
    %c0_41 = arith.constant 0 : index
    %c0_42 = arith.constant 0 : index
    %70 = vector.load %arg16[%c2_40, %c0_41, %c0_42] : memref<10x10x32xf32, #tpu.memory_space<vmem>>, vector<8x8x32xf32>
    %71 = vector.shape_cast %70 : vector<8x8x32xf32> to vector<64x32xf32>
    %c2_43 = arith.constant 2 : index
    %c1_44 = arith.constant 1 : index
    %c0_45 = arith.constant 0 : index
    %72 = vector.load %arg16[%c2_43, %c1_44, %c0_45] : memref<10x10x32xf32, #tpu.memory_space<vmem>>, vector<8x8x32xf32>
    %73 = vector.shape_cast %72 : vector<8x8x32xf32> to vector<64x32xf32>
    %c2_46 = arith.constant 2 : index
    %c2_47 = arith.constant 2 : index
    %c0_48 = arith.constant 0 : index
    %74 = vector.load %arg16[%c2_46, %c2_47, %c0_48] : memref<10x10x32xf32, #tpu.memory_space<vmem>>, vector<8x8x32xf32>
    %75 = vector.shape_cast %74 : vector<8x8x32xf32> to vector<64x32xf32>
    %76 = tpu.concatenate %59, %61, %63, %65, %67, %69, %71, %73, %75 in 1 : vector<64x32xf32>, vector<64x32xf32>, vector<64x32xf32>, vector<64x32xf32>, vector<64x32xf32>, vector<64x32xf32>, vector<64x32xf32>, vector<64x32xf32>, vector<64x32xf32> -> vector<64x288xf32>
    %cst_49 = arith.constant 0.000000e+00 : f32
    %77 = vector.broadcast %cst_49 : f32 to vector<10x10x32xf32>
    %c0_50 = arith.constant 0 : index
    %c0_51 = arith.constant 0 : index
    %c0_52 = arith.constant 0 : index
    %78 = vector.load %arg16[%c0_50, %c0_51, %c0_52] : memref<10x10x32xf32, #tpu.memory_space<vmem>>, vector<10x10x32xf32>
    tpu.vector_store %arg16[%c0_50, %c0_51, %c0_52], %77 {strides = array<i32>} : memref<10x10x32xf32, #tpu.memory_space<vmem>>, vector<10x10x32xf32>,
    %79 = vector.shape_cast %53 : vector<64x32xf32> to vector<8x8x32xf32>
    %c1_53 = arith.constant 1 : index
    %c1_54 = arith.constant 1 : index
    %c0_55 = arith.constant 0 : index
    %80 = vector.load %arg16[%c1_53, %c1_54, %c0_55] : memref<10x10x32xf32, #tpu.memory_space<vmem>>, vector<8x8x32xf32>
    tpu.vector_store %arg16[%c1_53, %c1_54, %c0_55], %79 {strides = array<i32>} : memref<10x10x32xf32, #tpu.memory_space<vmem>>, vector<8x8x32xf32>,
    %c0_56 = arith.constant 0 : index
    %c0_57 = arith.constant 0 : index
    %c0_58 = arith.constant 0 : index
    %81 = vector.load %arg16[%c0_56, %c0_57, %c0_58] : memref<10x10x32xf32, #tpu.memory_space<vmem>>, vector<8x8x32xf32>
    %82 = vector.shape_cast %81 : vector<8x8x32xf32> to vector<64x32xf32>
    %c0_59 = arith.constant 0 : index
    %c1_60 = arith.constant 1 : index
    %c0_61 = arith.constant 0 : index
    %83 = vector.load %arg16[%c0_59, %c1_60, %c0_61] : memref<10x10x32xf32, #tpu.memory_space<vmem>>, vector<8x8x32xf32>
    %84 = vector.shape_cast %83 : vector<8x8x32xf32> to vector<64x32xf32>
    %c0_62 = arith.constant 0 : index
    %c2_63 = arith.constant 2 : index
    %c0_64 = arith.constant 0 : index
    %85 = vector.load %arg16[%c0_62, %c2_63, %c0_64] : memref<10x10x32xf32, #tpu.memory_space<vmem>>, vector<8x8x32xf32>
    %86 = vector.shape_cast %85 : vector<8x8x32xf32> to vector<64x32xf32>
    %c1_65 = arith.constant 1 : index
    %c0_66 = arith.constant 0 : index
    %c0_67 = arith.constant 0 : index
    %87 = vector.load %arg16[%c1_65, %c0_66, %c0_67] : memref<10x10x32xf32, #tpu.memory_space<vmem>>, vector<8x8x32xf32>
    %88 = vector.shape_cast %87 : vector<8x8x32xf32> to vector<64x32xf32>
    %c1_68 = arith.constant 1 : index
    %c1_69 = arith.constant 1 : index
    %c0_70 = arith.constant 0 : index
    %89 = vector.load %arg16[%c1_68, %c1_69, %c0_70] : memref<10x10x32xf32, #tpu.memory_space<vmem>>, vector<8x8x32xf32>
    %90 = vector.shape_cast %89 : vector<8x8x32xf32> to vector<64x32xf32>
    %c1_71 = arith.constant 1 : index
    %c2_72 = arith.constant 2 : index
    %c0_73 = arith.constant 0 : index
    %91 = vector.load %arg16[%c1_71, %c2_72, %c0_73] : memref<10x10x32xf32, #tpu.memory_space<vmem>>, vector<8x8x32xf32>
    %92 = vector.shape_cast %91 : vector<8x8x32xf32> to vector<64x32xf32>
    %c2_74 = arith.constant 2 : index
    %c0_75 = arith.constant 0 : index
    %c0_76 = arith.constant 0 : index
    %93 = vector.load %arg16[%c2_74, %c0_75, %c0_76] : memref<10x10x32xf32, #tpu.memory_space<vmem>>, vector<8x8x32xf32>
    %94 = vector.shape_cast %93 : vector<8x8x32xf32> to vector<64x32xf32>
    %c2_77 = arith.constant 2 : index
    %c1_78 = arith.constant 1 : index
    %c0_79 = arith.constant 0 : index
    %95 = vector.load %arg16[%c2_77, %c1_78, %c0_79] : memref<10x10x32xf32, #tpu.memory_space<vmem>>, vector<8x8x32xf32>
    %96 = vector.shape_cast %95 : vector<8x8x32xf32> to vector<64x32xf32>
    %c2_80 = arith.constant 2 : index
    %c2_81 = arith.constant 2 : index
    %c0_82 = arith.constant 0 : index
    %97 = vector.load %arg16[%c2_80, %c2_81, %c0_82] : memref<10x10x32xf32, #tpu.memory_space<vmem>>, vector<8x8x32xf32>
    %98 = vector.shape_cast %97 : vector<8x8x32xf32> to vector<64x32xf32>
    %99 = tpu.concatenate %82, %84, %86, %88, %90, %92, %94, %96, %98 in 1 : vector<64x32xf32>, vector<64x32xf32>, vector<64x32xf32>, vector<64x32xf32>, vector<64x32xf32>, vector<64x32xf32>, vector<64x32xf32>, vector<64x32xf32>, vector<64x32xf32> -> vector<64x288xf32>
    %100 = tpu.concatenate %76, %99 in 0 : vector<64x288xf32>, vector<64x288xf32> -> vector<128x288xf32>
    %101 = arith.truncf %100 : vector<128x288xf32> to vector<128x288xbf16>
    %c0_83 = arith.constant 0 : index
    %c0_84 = arith.constant 0 : index
    %102 = vector.load %arg6[%c0_83, %c0_84] : memref<288x64xbf16, #tpu.memory_space<vmem>>, vector<288x64xbf16>
    %cst_85 = arith.constant dense<0.000000e+00> : vector<128x64xf32>
    %103 = tpu.matmul %101, %102, %cst_85 {dimension_numbers = #tpu.dot_dimension_numbers<[1], [0], [0], [1], [0, 0, 1, 1], [], []>} : vector<128x288xbf16>, vector<288x64xbf16>, vector<128x64xf32> -> vector<128x64xf32>
    %104 = vector.extract_strided_slice %103 {offsets = [0, 0], sizes = [64, 32], strides = [1, 1]} : vector<128x64xf32> to vector<64x32xf32>
    %105 = vector.extract_strided_slice %103 {offsets = [64, 32], sizes = [64, 32], strides = [1, 1]} : vector<128x64xf32> to vector<64x32xf32>
    %c0_86 = arith.constant 0 : index
    %c0_87 = arith.constant 0 : index
    %106 = vector.load %arg7[%c0_86, %c0_87] : memref<1x32xf32, #tpu.memory_space<vmem>>, vector<1x32xf32>
    %107 = vector.broadcast %106 : vector<1x32xf32> to vector<64x32xf32>
    %108 = arith.mulf %104, %107 : vector<64x32xf32>
    %c0_88 = arith.constant 0 : index
    %c0_89 = arith.constant 0 : index
    %109 = vector.load %arg8[%c0_88, %c0_89] : memref<1x32xf32, #tpu.memory_space<vmem>>, vector<1x32xf32>
    %110 = vector.broadcast %109 : vector<1x32xf32> to vector<64x32xf32>
    %111 = arith.addf %108, %110 : vector<64x32xf32>
    %cst_90 = arith.constant 0.000000e+00 : f32
    %112 = vector.broadcast %cst_90 : f32 to vector<64x32xf32>
    %113 = arith.maximumf %111, %112 : vector<64x32xf32>
    %c0_91 = arith.constant 0 : index
    %c0_92 = arith.constant 0 : index
    %114 = vector.load %arg9[%c0_91, %c0_92] : memref<1x32xf32, #tpu.memory_space<vmem>>, vector<1x32xf32>
    %115 = vector.broadcast %114 : vector<1x32xf32> to vector<64x32xf32>
    %116 = arith.mulf %105, %115 : vector<64x32xf32>
    %c0_93 = arith.constant 0 : index
    %c0_94 = arith.constant 0 : index
    %117 = vector.load %arg10[%c0_93, %c0_94] : memref<1x32xf32, #tpu.memory_space<vmem>>, vector<1x32xf32>
    %118 = vector.broadcast %117 : vector<1x32xf32> to vector<64x32xf32>
    %119 = arith.addf %116, %118 : vector<64x32xf32>
    %cst_95 = arith.constant 0.000000e+00 : f32
    %120 = vector.broadcast %cst_95 : f32 to vector<64x32xf32>
    %121 = arith.maximumf %119, %120 : vector<64x32xf32>
    %122 = tpu.concatenate %113, %121 in 1 : vector<64x32xf32>, vector<64x32xf32> -> vector<64x64xf32>
    %123 = arith.truncf %122 : vector<64x64xf32> to vector<64x64xbf16>
    %c0_96 = arith.constant 0 : index
    %c0_97 = arith.constant 0 : index
    %124 = vector.load %arg11[%c0_96, %c0_97] : memref<64x32xbf16, #tpu.memory_space<vmem>>, vector<64x32xbf16>
    %cst_98 = arith.constant dense<0.000000e+00> : vector<64x32xf32>
    %125 = tpu.matmul %123, %124, %cst_98 {dimension_numbers = #tpu.dot_dimension_numbers<[1], [0], [0], [1], [0, 0, 1, 1], [], []>} : vector<64x64xbf16>, vector<64x32xbf16>, vector<64x32xf32> -> vector<64x32xf32>
    %c0_99 = arith.constant 0 : index
    %c0_100 = arith.constant 0 : index
    %126 = vector.load %arg12[%c0_99, %c0_100] : memref<1x32xf32, #tpu.memory_space<vmem>>, vector<1x32xf32>
    %127 = vector.broadcast %126 : vector<1x32xf32> to vector<64x32xf32>
    %128 = arith.addf %125, %127 : vector<64x32xf32>
    %129 = arith.truncf %128 : vector<64x32xf32> to vector<64x32xbf16>
    %c0_101 = arith.constant 0 : index
    %c0_102 = arith.constant 0 : index
    %130 = vector.load %arg13[%c0_101, %c0_102] : memref<32x32xbf16, #tpu.memory_space<vmem>>, vector<32x32xbf16>
    %cst_103 = arith.constant dense<0.000000e+00> : vector<64x32xf32>
    %131 = tpu.matmul %129, %130, %cst_103 {dimension_numbers = #tpu.dot_dimension_numbers<[1], [0], [0], [1], [0, 0, 1, 1], [], []>} : vector<64x32xbf16>, vector<32x32xbf16>, vector<64x32xf32> -> vector<64x32xf32>
    %c0_104 = arith.constant 0 : index
    %c0_105 = arith.constant 0 : index
    %132 = vector.load %arg14[%c0_104, %c0_105] : memref<1x32xf32, #tpu.memory_space<vmem>>, vector<1x32xf32>
    %133 = vector.broadcast %132 : vector<1x32xf32> to vector<64x32xf32>
    %134 = arith.addf %131, %133 : vector<64x32xf32>
    %c0_106 = arith.constant 0 : index
    %c0_107 = arith.constant 0 : index
    %c0_108 = arith.constant 0 : index
    %135 = vector.load %arg15[%c0_106, %c0_107, %c0_108] : memref<1x64x32xf32, #tpu.memory_space<vmem>>, vector<1x64x32xf32>
    %136 = vector.shape_cast %135 : vector<1x64x32xf32> to vector<64x32xf32>
    %137 = vector.shape_cast %134 : vector<64x32xf32> to vector<1x64x32xf32>
    tpu.vector_store %arg15[%c0_106, %c0_107, %c0_108], %137 {strides = array<i32>} : memref<1x64x32xf32, #tpu.memory_space<vmem>>, vector<1x64x32xf32>,
    return
  }
  func.func @transform_0(%arg0: i32) -> (i32, i32, i32) {
    %c0_i32 = arith.constant 0 : i32
    %c0_i32_0 = arith.constant 0 : i32
    %c0_i32_1 = arith.constant 0 : i32
    return %arg0, %c0_i32, %c0_i32_0 : i32, i32, i32
  }
  func.func @transform_1(%arg0: i32) -> (i32, i32, i32) {
    %c0_i32 = arith.constant 0 : i32
    %c0_i32_0 = arith.constant 0 : i32
    %c0_i32_1 = arith.constant 0 : i32
    return %arg0, %c0_i32, %c0_i32_0 : i32, i32, i32
  }
  func.func @transform_2(%arg0: i32) -> (i32, i32) {
    %c0_i32 = arith.constant 0 : i32
    %c0_i32_0 = arith.constant 0 : i32
    %c0_i32_1 = arith.constant 0 : i32
    return %c0_i32, %c0_i32_0 : i32, i32
  }
  func.func @transform_3(%arg0: i32) -> (i32, i32) {
    %c0_i32 = arith.constant 0 : i32
    %c0_i32_0 = arith.constant 0 : i32
    %c0_i32_1 = arith.constant 0 : i32
    return %c0_i32, %c0_i32_0 : i32, i32
  }
  func.func @transform_4(%arg0: i32) -> (i32, i32) {
    %c0_i32 = arith.constant 0 : i32
    %c0_i32_0 = arith.constant 0 : i32
    %c0_i32_1 = arith.constant 0 : i32
    return %c0_i32, %c0_i32_0 : i32, i32
  }
  func.func @transform_5(%arg0: i32) -> (i32, i32) {
    %c0_i32 = arith.constant 0 : i32
    %c0_i32_0 = arith.constant 0 : i32
    %c0_i32_1 = arith.constant 0 : i32
    return %c0_i32, %c0_i32_0 : i32, i32
  }
  func.func @transform_6(%arg0: i32) -> (i32, i32) {
    %c0_i32 = arith.constant 0 : i32
    %c0_i32_0 = arith.constant 0 : i32
    %c0_i32_1 = arith.constant 0 : i32
    return %c0_i32, %c0_i32_0 : i32, i32
  }
  func.func @transform_7(%arg0: i32) -> (i32, i32) {
    %c0_i32 = arith.constant 0 : i32
    %c0_i32_0 = arith.constant 0 : i32
    %c0_i32_1 = arith.constant 0 : i32
    return %c0_i32, %c0_i32_0 : i32, i32
  }
  func.func @transform_8(%arg0: i32) -> (i32, i32) {
    %c0_i32 = arith.constant 0 : i32
    %c0_i32_0 = arith.constant 0 : i32
    %c0_i32_1 = arith.constant 0 : i32
    return %c0_i32, %c0_i32_0 : i32, i32
  }
  func.func @transform_9(%arg0: i32) -> (i32, i32) {
    %c0_i32 = arith.constant 0 : i32
    %c0_i32_0 = arith.constant 0 : i32
    %c0_i32_1 = arith.constant 0 : i32
    return %c0_i32, %c0_i32_0 : i32, i32
  }
  func.func @transform_10(%arg0: i32) -> (i32, i32) {
    %c0_i32 = arith.constant 0 : i32
    %c0_i32_0 = arith.constant 0 : i32
    %c0_i32_1 = arith.constant 0 : i32
    return %c0_i32, %c0_i32_0 : i32, i32
  }
  func.func @transform_11(%arg0: i32) -> (i32, i32) {
    %c0_i32 = arith.constant 0 : i32
    %c0_i32_0 = arith.constant 0 : i32
    %c0_i32_1 = arith.constant 0 : i32
    return %c0_i32, %c0_i32_0 : i32, i32
  }
  func.func @transform_12(%arg0: i32) -> (i32, i32) {
    %c0_i32 = arith.constant 0 : i32
    %c0_i32_0 = arith.constant 0 : i32
    %c0_i32_1 = arith.constant 0 : i32
    return %c0_i32, %c0_i32_0 : i32, i32
  }
  func.func @transform_13(%arg0: i32) -> (i32, i32) {
    %c0_i32 = arith.constant 0 : i32
    %c0_i32_0 = arith.constant 0 : i32
    %c0_i32_1 = arith.constant 0 : i32
    return %c0_i32, %c0_i32_0 : i32, i32
  }
  func.func @transform_14(%arg0: i32) -> (i32, i32, i32) {
    %c0_i32 = arith.constant 0 : i32
    %c0_i32_0 = arith.constant 0 : i32
    %c0_i32_1 = arith.constant 0 : i32
    return %arg0, %c0_i32, %c0_i32_0 : i32, i32, i32
  }
}

</mosaic_0001>

<bundles_post_ra>
// kernel: tpu_custom_call.1
= control target key start
LH: loop header
LB: loop body
LE: loop exit
PB: predicated region body
PF: predicated region fallthrough
CT: control target
= control target key end

     0   :  { %19 = vsyncpa [#allocation4], 0  ;;  %s3101_s29 = smov 0   ;;  %s4062_s0 = inlined_call_operand.vmem [shape: f32[2,64,32], index: 0, kind: input, shape index: {}]   ;;  %s4063_s1 = inlined_call_operand.vmem [shape: f32[2,64,32], index: 1, kind: input, shape index: {}]   ;;  %s4064_s2 = inlined_call_operand.vmem [shape: bf16[32,96], index: 2, kind: input, shape index: {}]   ;;  %s4065_s3 = inlined_call_operand.vmem [shape: f32[1,96], index: 3, kind: input, shape index: {}]   ;;  %s4066_s4 = inlined_call_operand.vmem [shape: f32[1,2], index: 4, kind: input, shape index: {}]   ;;  %s4067_s5 = inlined_call_operand.vmem [shape: bf16[288,64], index: 5, kind: input, shape index: {}]   ;;  %s4068_s6 = inlined_call_operand.vmem [shape: f32[1,32], index: 6, kind: input, shape index: {}]   ;;  %s4069_s7 = inlined_call_operand.vmem [shape: f32[1,32], index: 7, kind: input, shape index: {}]   ;;  %s4070_s8 = inlined_call_operand.vmem [shape: f32[1,32], index: 8, kind: input, shape index: {}]   ;;  %s4071_s9 = inlined_call_operand.vmem [shape: f32[1,32], index: 9, kind: input, shape index: {}]   ;;  %s4072_s10 = inlined_call_operand.vmem [shape: bf16[64,32], index: 10, kind: input, shape index: {}]   ;;  %s4073_s11 = inlined_call_operand.vmem [shape: f32[1,32], index: 11, kind: input, shape index: {}]   ;;  %s4074_s12 = inlined_call_operand.vmem [shape: bf16[32,32], index: 12, kind: input, shape index: {}]   ;;  %s4075_s13 = inlined_call_operand.vmem [shape: f32[1,32], index: 13, kind: input, shape index: {}]   ;;  %s4076_s14 = inlined_call_operand.vmem [shape: f32[2,64,32], index: 14, kind: output, shape index: {}]  }
   0x1 LB: > { %s2457_s30 = sadd.s32 4294967295, %s3018_s29   ;;  %p2459_p0 = scmp.ge.s32.totalorder %s3018_s29, 1  ;;  %s3018_s29 = sphi %s3101_s29, %s25_s29  }
   0x2   : > { %p360_p1 = scmp.lt.s32.totalorder %s3018_s29, 3  ;;  %s378_s17 = sshll.u32 %s4066_s4, 4  ;;  %s379_s17 = int_to_ptr.vmem [resolvable:$true] %s378_s17 }
   0x3   : > { %p2658_p3 = scmp.eq.s32.totalorder %s2457_s30, 0  ;;  %s3020_s18 = smov [#allocation3]  }
   0x4   : > { %p361_p2 = pnand %p2459_p0, %p360_p1 }
   0x6   : > { %p2654_p4 = pneg %p361_p2  ;;  %434 = sbr.rel (%p361_p2) target bundleno = 1741 (0x6cd), region = 76 }
   0x8   : > { %p2655_p5 = pnand %p2658_p3, %p2654_p4 }
   0xa   : > { %2657 = dma.vmem_to_smem (!%p2655_p5), %s379_s17, 16, %s3020_s18, [#allocation4]  }
   0xb   : > { %3013 = dma.done.wait (%p2658_p3), [#allocation4], 16  }
   0xc   : > { %3015 = vsyncadd (%p2658_p3), [#allocation4], 4294967280 }
   0xd   : > { %441 = sfence }
   0xe   : > { %v2621_v0 = vld [vmem:[%s4064_s2 + $0x8] sm:$0xff]  ;;  %p487_p6 = scmp.lt.s32.totalorder %s2457_s30, 1  ;;  %v2620_v1 = vld [vmem:[%s4064_s2] sm:$0xff]  ;;  %vm567_vm0 = vcmask 261120   ;;  %s3021_s17 = smov 112   ;;  %vm761_vm1 = vcmask 130048  }
   0xf   : > { %622 = vmatpush.bf16.msra.mxu0 %v2621_v0  ;;  %v3219_v53 = vld [vmem:[%s4065_s3] ss:$0 sm:$0xff]  ;;  %s3022_s18 = smov 96   ;;  %vm815_vm2 = vcmask 523264   ;;  %s3023_s19 = smov 32   ;;  %vm1094_vm3 = vcmask 254976  }
  0x10   : > { %s4078_s30 = smov (!%p487_p6, %s2457_s30), 1  ;;  %s1025_s20 = sld [smem:[#allocation3]]  ;;  %vm1404_vm4 = vcmask 785408  }
  0x11   : > { %s3118_s23 = sshll.u32 %s4078_s30, 6  ;;  %s2502_s21 = sld [smem:[#allocation3 + $0x1]] }
  0x12   : > { %s491_s26 = scalar_lea.vmem %s4062_s0, %s3118_s23  ;;  %s496_s15 = scalar_lea.vmem %s4063_s1, %s3118_s23 }
  0x13   : > { %623 = vmatpush.bf16.msra.mxu0 %v2620_v1  ;;  %v3128_v2 = vld [vmem:[%s491_s26] sm:$0xff]  ;;  %v3130_v3 = vld [vmem:[%s491_s26 + $0x8] sm:$0xff]  ;;  %v3141_v9 = vld [vmem:[%s491_s26 + $0x10] sm:$0xff]  ;;  %s3025_s27 = smov 64   ;;  %s501_s24 = scalar_lea.vmem %s4076_s14, %s3118_s23 }
  0x14   : > { %v3132_v4 = vld [vmem:[%s496_s15] sm:$0xff]  ;;  %v3134_v5 = vld [vmem:[%s496_s15 + $0x8] sm:$0xff]  ;;  %v3143_v10 = vld [vmem:[%s491_s26 + $0x18] sm:$0xff]  ;;  %v543_v62 = vpack.c.bf16 %v3130_v3, %v3128_v2 }
  0x15   : > { %v519_v6 = vadd.f32 %v3132_v4, %v3128_v2  ;;  %v520_v7 = vadd.f32 %v3134_v5, %v3130_v3  ;;  %v3145_v11 = vld [vmem:[%s496_s15 + $0x10] sm:$0xff]  ;;  %v3147_v12 = vld [vmem:[%s496_s15 + $0x18] sm:$0xff]  ;;  %v3154_v16 = vld [vmem:[%s491_s26 + $0x20] sm:$0xff]  ;;  %v527_v30 = vmul.f32 %v3132_v4, %v3128_v2  ;;  %v528_v31 = vmul.f32 %v3134_v5, %v3130_v3 }
  0x16   : > { %v521_v13 = vadd.f32 %v3145_v11, %v3141_v9  ;;  %v522_v14 = vadd.f32 %v3147_v12, %v3143_v10  ;;  %v3156_v17 = vld [vmem:[%s491_s26 + $0x28] sm:$0xff]  ;;  %v3158_v18 = vld [vmem:[%s496_s15 + $0x20] sm:$0xff]  ;;  %v3167_v23 = vld [vmem:[%s491_s26 + $0x30] sm:$0xff]  ;;  %v529_v33 = vmul.f32 %v3145_v11, %v3141_v9  ;;  %v530_v34 = vmul.f32 %v3147_v12, %v3143_v10 }
  0x17   : > { %v535_v8 = vpack.c.bf16 %v520_v7, %v519_v6  ;;  %v3160_v19 = vld [vmem:[%s496_s15 + $0x28] sm:$0xff]  ;;  %v523_v20 = vadd.f32 %v3158_v18, %v3154_v16  ;;  %v3169_v24 = vld [vmem:[%s491_s26 + $0x38] sm:$0xff]  ;;  %v3171_v25 = vld [vmem:[%s496_s15 + $0x30] sm:$0xff]  ;;  %v539_v32 = vpack.c.bf16 %v528_v31, %v527_v30  ;;  %v531_v36 = vmul.f32 %v3158_v18, %v3154_v16 }
  0x18   : > { %v536_v15 = vpack.c.bf16 %v522_v14, %v521_v13  ;;  %v524_v21 = vadd.f32 %v3160_v19, %v3156_v17  ;;  %v3173_v26 = vld [vmem:[%s496_s15 + $0x38] sm:$0xff]  ;;  %v525_v27 = vadd.f32 %v3171_v25, %v3167_v23  ;;  %v540_v35 = vpack.c.bf16 %v530_v34, %v529_v33 }
  0x19   : > { %2478 = vmatmul.msk.bf16.vlgmr.msra.gmra.mxu0 %vm567_vm0, %v535_v8  ;;  %v526_v28 = vadd.f32 %v3173_v26, %v3169_v24  ;;  %v532_v37 = vmul.f32 %v3160_v19, %v3156_v17  ;;  %v533_v39 = vmul.f32 %v3171_v25, %v3167_v23  ;;  %v534_v40 = vmul.f32 %v3173_v26, %v3169_v24 }
  0x1a   : > { %v537_v22 = vpack.c.bf16 %v524_v21, %v523_v20  ;;  %v544_v1 = vpack.c.bf16 %v3143_v10, %v3141_v9  ;;  %v545_v21 = vpack.c.bf16 %v3156_v17, %v3154_v16  ;;  %v549_v31 = vpack.c.bf16 %v3160_v19, %v3158_v18 }
  0x1b   : > { %v538_v29 = vpack.c.bf16 %v526_v28, %v525_v27  ;;  %v541_v38 = vpack.c.bf16 %v532_v37, %v531_v36  ;;  %v542_v41 = vpack.c.bf16 %v534_v40, %v533_v39  ;;  %v547_v27 = vpack.c.bf16 %v3134_v5, %v3132_v4 }
  0x1c   : > { %v548_v28 = vpack.c.bf16 %v3147_v12, %v3145_v11 }
  0x29   : > { %2479 = vmatmul.msk.bf16.gmra.mxu0 %vm567_vm0, %v536_v15 }
  0x39   : > { %2480 = vmatmul.msk.bf16.gmra.mxu0 %vm567_vm0, %v537_v22  ;;  %v546_v22 = vpack.c.bf16 %v3169_v24, %v3167_v23 }
  0x49   : > { %2481 = vmatmul.msk.bf16.gmra.mxu0 %vm567_vm0, %v538_v29 }
  0x59   : > { %2482 = vmatmul.msk.bf16.gmra.mxu0 %vm567_vm0, %v539_v32 }
  0x69   : > { %2483 = vmatmul.msk.bf16.gmra.mxu0 %vm567_vm0, %v540_v35 }
  0x79   : > { %2484 = vmatmul.msk.bf16.gmra.mxu0 %vm567_vm0, %v541_v38  ;;  %v550_v38 = vpack.c.bf16 %v3173_v26, %v3171_v25 }
  0x89   : > { %2485 = vmatmul.msk.bf16.gmra.mxu0 %vm567_vm0, %v542_v41 }
  0x96   : > { %v3200_v42 = vpop.f32.mrf.mxu0 }
  0x99   : > { %2486 = vmatmul.msk.bf16.gmra.mxu0 %vm567_vm0, %v543_v62 }
  0x9e   : > { %v3202_v43 = vpop.f32.mrf.mxu0 }
  0xa6   : > { %v3204_v44 = vpop.f32.mrf.mxu0 }
  0xa9   : > { %2487 = vmatmul.msk.bf16.gmra.mxu0 %vm567_vm0, %v544_v1 }
  0xae   : > { %v3206_v45 = vpop.f32.mrf.mxu0 }
  0xb6   : > { %v3208_v46 = vpop.f32.mrf.mxu0 }
  0xb9   : > { %2488 = vmatmul.msk.bf16.gmra.mxu0 %vm567_vm0, %v545_v21 }
  0xbe   : > { %v3210_v47 = vpop.f32.mrf.mxu0 }
  0xc6   : > { %v3212_v48 = vpop.f32.mrf.mxu0 }
  0xc9   : > { %2489 = vmatmul.msk.bf16.gmra.mxu0 %vm567_vm0, %v546_v22 }
  0xce   : > { %v3214_v49 = vpop.f32.mrf.mxu0 }
  0xd6   : > { %v645_v50 = vpop.f32.mrf.mxu0 }
  0xd7   : > { %v717_v60 = vadd.f32 %v3219_v53, %v645_v50 }
  0xd9   : > { %2490 = vmatmul.msk.bf16.gmra.mxu0 %vm567_vm0, %v547_v27 }
  0xde   : > { %v647_v51 = vpop.f32.mrf.mxu0 }
  0xdf   : > { %v718_v58 = vadd.f32 %v3219_v53, %v647_v51  ;;  %v710_v51 = vadd.f32 %v3219_v53, %v3202_v43  ;;  %v712_v43 = vadd.f32 %v3219_v53, %v3206_v45  ;;  %v713_v45 = vadd.f32 %v3219_v53, %v3208_v46 }
  0xe1   : > { %v745_v61 = vpack.c.bf16 %v718_v58, %v717_v60 }
  0xe6   : > { %v650_v52 = vpop.f32.mrf.mxu0 }
  0xe7   : > { %v719_v55 = vadd.f32 %v3219_v53, %v650_v52 }
  0xe9   : > { %2491 = vmatmul.msk.bf16.gmra.mxu0 %vm567_vm0, %v548_v28 }
  0xee   : > { %v652_v54 = vpop.f32.mrf.mxu0 }
  0xef   : > { %v720_v56 = vadd.f32 %v3219_v53, %v652_v54  ;;  %v709_v54 = vadd.f32 %v3219_v53, %v3200_v42  ;;  %v711_v42 = vadd.f32 %v3219_v53, %v3204_v44 }
  0xf1   : > { %v746_v57 = vpack.c.bf16 %v720_v56, %v719_v55  ;;  %v741_v55 = vpack.c.bf16 %v710_v51, %v709_v54 }
  0xf3   : > { %755 = vrot.lane.b32.xlu1 %v746_v57, %s3021_s17 }
  0xf6   : > { %v655_v59 = vpop.f32.mrf.mxu0 }
  0xf7   : > { %v721_v15 = vadd.f32 %v3219_v53, %v655_v59 }
  0xf9   : > { %2492 = vmatmul.msk.bf16.gmra.mxu0 %vm567_vm0, %v549_v31 }
  0xfb   : > { %753 = vrot.lane.b32.xlu1 %v745_v61, %s3021_s17  ;;  %v742_v61 = vpack.c.bf16 %v712_v43, %v711_v42 }
  0xfe   : > { %v657_v63 = vpop.f32.mrf.mxu0 }
  0xff   : > { %v722_v14 = vadd.f32 %v3219_v53, %v657_v63 }
 0x101   : > { %v747_v20 = vpack.c.bf16 %v722_v14, %v721_v15  ;;  %v715_v14 = vadd.f32 %v3219_v53, %v3212_v48 }
 0x106   : > { %v660_v0 = vpop.f32.mrf.mxu0 }
 0x107   : > { %v723_v7 = vadd.f32 %v3219_v53, %v660_v0 }
 0x109   : > { %2493 = vmatmul.msk.bf16.gmra.mxu0 %vm567_vm0, %v550_v38 }
 0x10e   : > { %v662_v6 = vpop.f32.mrf.mxu0 }
 0x10f   : > { %v724_v8 = vadd.f32 %v3219_v53, %v662_v6  ;;  %v714_v6 = vadd.f32 %v3219_v53, %v3210_v47 }
 0x111   : > { %v748_v13 = vpack.c.bf16 %v724_v8, %v723_v7  ;;  %v743_v44 = vpack.c.bf16 %v714_v6, %v713_v45 }
 0x113   : > { %759 = vrot.lane.b32.xlu0 %v748_v13, %s3021_s17  ;;  %v716_v13 = vadd.f32 %v3219_v53, %v3214_v49 }
 0x115   : > { %v744_v47 = vpack.c.bf16 %v716_v13, %v715_v14 }
 0x116   : > { %v665_v36 = vpop.f32.mrf.mxu0 }
 0x117   : > { %v3256_v39 = vadd.f32 %v3219_v53, %v665_v36 }
 0x11b   : > { %757 = vrot.lane.b32.xlu0 %v747_v20, %s3021_s17 }
 0x11e   : > { %v667_v41 = vpop.f32.mrf.mxu0 }
 0x11f   : > { %v3261_v50 = vadd.f32 %v3219_v53, %v667_v41 }
 0x121   : > { %v2704_v52 = vpack.i.bf16 %v3261_v50, %v3256_v39 }
 0x126   : > { %v670_v56 = vpop.f32.mrf.mxu0 }
 0x127   : > { %v3271_v57 = vadd.f32 %v3219_v53, %v670_v56 }
 0x12e   : > { %v672_v58 = vpop.f32.mrf.mxu0 }
 0x12f   : > { %v3274_v59 = vadd.f32 %v3219_v53, %v672_v58 }
 0x131   : > { %v2694_v60 = vpack.i.bf16 %v3274_v59, %v3271_v57 }
 0x136   : > { %v675_v62 = vpop.f32.mrf.mxu0 }
 0x137   : > { %v729_v63 = vadd.f32 %v3219_v53, %v675_v62 }
 0x13e   : > { %v677_v0 = vpop.f32.mrf.mxu0 }
 0x13f   : > { %v730_v1 = vadd.f32 %v3219_v53, %v677_v0 }
 0x141   : > { %v2684_v7 = vpack.i.bf16 %v730_v1, %v729_v63 }
 0x143   : > { %2685 = vrot.lane.b32.xlu1 %v2684_v7, %s3022_s18 }
 0x146   : > { %v680_v8 = vpop.f32.mrf.mxu0 }
 0x147   : > { %v731_v15 = vadd.f32 %v3219_v53, %v680_v8 }
 0x14e   : > { %v682_v20 = vpop.f32.mrf.mxu0 }
 0x14f   : > { %v732_v21 = vadd.f32 %v3219_v53, %v682_v20 }
 0x151   : > { %v2674_v46 = vpack.i.bf16 %v732_v21, %v731_v15 }
 0x153   : > { %2675 = vrot.lane.b32.xlu2 %v2674_v46, %s3022_s18 }
 0x156   : > { %v685_v22 = vpop.f32.mrf.mxu0 }
 0x157   : > { %v733_v27 = vadd.f32 %v3219_v53, %v685_v22 }
 0x15e   : > { %v687_v28 = vpop.f32.mrf.mxu0 }
 0x15f   : > { %v734_v49 = vadd.f32 %v3219_v53, %v687_v28 }
 0x165   : > { %v756_v34 = vpop.permute.xlu1 %755 }
 0x166   : > { %v778_v35 = vsel %vm761_vm1, %v756_v34, 0 }
 0x16d   : > { %v754_v37 = vpop.permute.xlu1 %753 }
 0x16e   : > { %v775_v40 = vsel %vm761_vm1, %v754_v37, 0 }
 0x185   : > { %v760_v29 = vpop.permute.xlu0 %759 }
 0x186   : > { %v784_v30 = vsel %vm761_vm1, %v760_v29, 0  ;;  %v2709_v29 = vpack.i.bf16 %v734_v49, %v733_v27 }
 0x187   : > { %790 = vmatpush.bf16.xpose.msra.mxu1 %v784_v30  ;;  %v690_v30 = vpop.f32.mrf.mxu0 }
 0x188   : > { %v735_v1 = vadd.f32 %v3219_v53, %v690_v30 }
 0x18d   : > { %v758_v32 = vpop.permute.xlu0 %757 }
 0x18e   : > { %v781_v33 = vsel %vm761_vm1, %v758_v32, 0 }
 0x18f   : > { %791 = vmatpush.bf16.xpose.msra.mxu1 %v781_v33  ;;  %v692_v48 = vpop.f32.mrf.mxu0 }
 0x190   : > { %v736_v6 = vadd.f32 %v3219_v53, %v692_v48 }
 0x192   : > { %v2699_v7 = vpack.i.bf16 %v736_v6, %v735_v1 }
 0x197   : > { %792 = vmatpush.bf16.xpose.msra.mxu1 %v778_v35  ;;  %v695_v31 = vpop.f32.mrf.mxu0 }
 0x198   : > { %v737_v8 = vadd.f32 %v3219_v53, %v695_v31 }
 0x19f   : > { %793 = vmatpush.bf16.xpose.msra.mxu1 %v775_v40  ;;  %v697_v34 = vpop.f32.mrf.mxu0 }
 0x1a0   : > { %v738_v57 = vadd.f32 %v3219_v53, %v697_v34 }
 0x1a2   : > { %v2689_v59 = vpack.i.bf16 %v738_v57, %v737_v8 }
 0x1a6   : > { %2494 = vmatmul.msk.bf16.vlgmr.msra.gmra.mxu1 %vm761_vm1, %v741_v55 }
 0x1a7   : > { %v700_v40 = vpop.f32.mrf.mxu0 }
 0x1a8   : > { %v739_v55 = vadd.f32 %v3219_v53, %v700_v40 }
 0x1af   : > { %v702_v54 = vpop.f32.mrf.mxu0 }
 0x1b0   : > { %v740_v56 = vadd.f32 %v3219_v53, %v702_v54 }
 0x1b2   : > { %v2679_v42 = vpack.i.bf16 %v740_v56, %v739_v55 }
 0x1b6   : > { %2495 = vmatmul.msk.bf16.gmra.mxu1 %vm761_vm1, %v742_v61 }
 0x1c6   : > { %2496 = vmatmul.msk.bf16.gmra.mxu1 %vm761_vm1, %v743_v44 }
 0x1d6   : > { %2497 = vmatmul.msk.bf16.gmra.mxu1 %vm761_vm1, %v744_v47 }
 0x223   : > { %v795_v32 = vpop.f32.mrf.mxu1 }
 0x224   : > { %v816_v33 = vsel %vm815_vm2, %v795_v32, -inf }
 0x225   : > { %817 = vmax.xlane.f32.xlu2 %v816_v33 }
 0x22b   : > { %v797_v35 = vpop.f32.mrf.mxu1 }
 0x22c   : > { %v819_v36 = vsel %vm815_vm2, %v797_v35, -inf }
 0x22d   : > { %820 = vmax.xlane.f32.xlu2 %v819_v36 }
 0x233   : > { %v800_v37 = vpop.f32.mrf.mxu1 }
 0x234   : > { %v822_v38 = vsel %vm815_vm2, %v800_v37, -inf }
 0x235   : > { %823 = vmax.xlane.f32.xlu0 %v822_v38 }
 0x23b   : > { %v802_v41 = vpop.f32.mrf.mxu1 }
 0x23c   : > { %v825_v51 = vsel %vm815_vm2, %v802_v41, -inf }
 0x23d   : > { %826 = vmax.xlane.f32.xlu1 %v825_v51 }
 0x243   : > { %v805_v58 = vpop.f32.mrf.mxu1 }
 0x244   : > { %v828_v43 = vsel %vm815_vm2, %v805_v58, -inf }
 0x245   : > { %829 = vmax.xlane.f32.xlu2 %v828_v43 }
 0x249   : > { %2680 = vrot.lane.b32.xlu0 %v2679_v42, %s3022_s18 }
 0x24b   : > { %v3309_v61 = vpop.f32.mrf.mxu1 }
 0x24c   : > { %v831_v62 = vsel %vm815_vm2, %v3309_v61, -inf }
 0x24d   : > { %832 = vmax.xlane.f32.xlu2 %v831_v62 }
 0x253   : > { %v3313_v63 = vpop.f32.mrf.mxu1 }
 0x254   : > { %v834_v0 = vsel %vm815_vm2, %v3313_v63, -inf }
 0x255   : > { %835 = vmax.xlane.f32.xlu2 %v834_v0 }
 0x256   : > { %2695 = vrot.lane.b32.xlu1 %v2694_v60, %s3022_s18  ;;  %v2676_v60 = vpop.permute.xlu2 %2675 }
 0x257   : > { %v2677_v38 = vunpack.i.l.bf16 %v2676_v60 }
 0x25b   : > { %v3323_v45 = vpop.f32.mrf.mxu1 }
 0x25c   : > { %v837_v44 = vsel %vm815_vm2, %v3323_v45, -inf }
 0x25d   : > { %838 = vmax.xlane.f32.xlu2 %v837_v44 }
 0x25e   : > { %2700 = vrot.lane.b32.xlu1 %v2699_v7, %s3022_s18 }
 0x266   : > { %2705 = vrot.lane.b32.xlu1 %v2704_v52, %s3022_s18  ;;  %v3340_v52 = vpop.permute.xlu1 %2685 }
 0x26e   : > { %2710 = vrot.lane.b32.xlu1 %v2709_v29, %s3022_s18 }
 0x275   : > { %2690 = vrot.lane.b32.xlu2 %v2689_v59, %s3022_s18 }
 0x298   : > { %v818_v13 = vpop.xlane.xlu2 %817 }
 0x299   : > { %v840_v14 = vsub.f32 %v795_v32, %v818_v13 }
 0x29b   : > { %v848_v15 = vmul.f32 1.442695, %v840_v14 }
 0x29d   : > { %2961 = vpow2.f32 %v848_v15  ;;  %v2688_v15 = vunpack.i.h.bf16 %v3340_v52 }
 0x2a0   : > { %v821_v47 = vpop.xlane.xlu2 %820 }
 0x2a1   : > { %v841_v20 = vsub.f32 %v797_v35, %v821_v47  ;;  %v2678_v35 = vunpack.i.h.bf16 %v2676_v60  ;;  %v2687_v47 = vunpack.i.l.bf16 %v3340_v52 }
 0x2a3   : > { %v3336_v21 = vpop.eup %2961  ;;  %v850_v39 = vmul.f32 1.442695, %v841_v20 }
 0x2a4   : > { %v864_v50 = vsel %vm815_vm2, %v3336_v21, 0.0 }
 0x2a5   : > { %2963 = vpow2.f32 %v850_v39  ;;  %865 = vadd.xlane.f32.xlu0 %v864_v50 }
 0x2a8   : > { %v824_v53 = vpop.xlane.xlu0 %823 }
 0x2a9   : > { %v842_v46 = vsub.f32 %v800_v37, %v824_v53 }
 0x2ab   : > { %v3342_v22 = vpop.eup %2963  ;;  %v852_v27 = vmul.f32 1.442695, %v842_v46 }
 0x2ac   : > { %v867_v28 = vsel %vm815_vm2, %v3342_v22, 0.0 }
 0x2ad   : > { %2965 = vpow2.f32 %v852_v27  ;;  %868 = vadd.xlane.f32.xlu2 %v867_v28 }
 0x2b0   : > { %v827_v49 = vpop.xlane.xlu1 %826 }
 0x2b1   : > { %v843_v29 = vsub.f32 %v802_v41, %v827_v49 }
 0x2b3   : > { %v3346_v30 = vpop.eup %2965  ;;  %v854_v48 = vmul.f32 1.442695, %v843_v29 }
 0x2b4   : > { %v870_v31 = vsel %vm815_vm2, %v3346_v30, 0.0 }
 0x2b5   : > { %2967 = vpow2.f32 %v854_v48  ;;  %871 = vadd.xlane.f32.xlu1 %v870_v31 }
 0x2b8   : > { %v830_v32 = vpop.xlane.xlu2 %829 }
 0x2b9   : > { %v844_v33 = vsub.f32 %v805_v58, %v830_v32 }
 0x2bb   : > { %v3350_v34 = vpop.eup %2967  ;;  %v856_v36 = vmul.f32 1.442695, %v844_v33  ;;  %v2681_v37 = vpop.permute.xlu0 %2680 }
 0x2bc   : > { %v2683_v40 = vunpack.i.h.bf16 %v2681_v37  ;;  %v2682_v51 = vunpack.i.l.bf16 %v2681_v37  ;;  %v873_v41 = vsel %vm815_vm2, %v3350_v34, 0.0 }
 0x2bd   : > { %2969 = vpow2.f32 %v856_v36  ;;  %874 = vadd.xlane.f32.xlu0 %v873_v41 }
 0x2be   : > { %v974_v54 = vsel %vm567_vm0, %v2677_v38, %v2682_v51  ;;  %v975_v55 = vsel %vm567_vm0, %v2678_v35, %v2683_v40 }
 0x2bf   : > { %v979_v56 = vpack.c.bf16 %v975_v55, %v974_v54 }
 0x2c0   : > { %v833_v43 = vpop.xlane.xlu2 %832 }
 0x2c1   : > { %v845_v58 = vsub.f32 %v3309_v61, %v833_v43  ;;  %1000 = vmatpush.bf16.msrb.mxu1 %v979_v56  ;;  %2646 = vmatpush.bf16.msra.mxu2 %v979_v56 }
 0x2c3   : > { %v3357_v42 = vpop.eup %2969  ;;  %v858_v62 = vmul.f32 1.442695, %v845_v58 }
 0x2c4   : > { %v876_v0 = vsel %vm815_vm2, %v3357_v42, 0.0 }
 0x2c5   : > { %2971 = vpow2.f32 %v858_v62  ;;  %877 = vadd.xlane.f32.xlu2 %v876_v0 }
 0x2c8   : > { %v2696_v1 = vpop.permute.xlu1 %2695  ;;  %v836_v6 = vpop.xlane.xlu2 %835 }
 0x2c9   : > { %v846_v7 = vsub.f32 %v3313_v63, %v836_v6  ;;  %v2698_v27 = vunpack.i.h.bf16 %v2696_v1  ;;  %v2697_v28 = vunpack.i.l.bf16 %v2696_v1 }
 0x2cb   : > { %v3362_v44 = vpop.eup %2971  ;;  %v860_v8 = vmul.f32 1.442695, %v846_v7 }
 0x2cc   : > { %v879_v61 = vsel %vm815_vm2, %v3362_v44, 0.0 }
 0x2cd   : > { %2973 = vpow2.f32 %v860_v8  ;;  %880 = vadd.xlane.f32.xlu0 %v879_v61 }
 0x2ce   : > { %1065 = vrot.lane.b32.xlu1 %v3145_v11, %s3023_s19 }
 0x2d0   : > { %v839_v57 = vpop.xlane.xlu2 %838  ;;  %v2701_v59 = vpop.permute.xlu1 %2700 }
 0x2d1   : > { %v847_v60 = vsub.f32 %v3323_v45, %v839_v57  ;;  %v2703_v39 = vunpack.i.h.bf16 %v2701_v59  ;;  %v2702_v50 = vunpack.i.l.bf16 %v2701_v59 }
 0x2d3   : > { %v3369_v13 = vpop.eup %2973  ;;  %v862_v14 = vmul.f32 1.442695, %v847_v60  ;;  %v970_v52 = vsel %vm567_vm0, %v2697_v28, %v2702_v50  ;;  %v971_v31 = vsel %vm567_vm0, %v2698_v27, %v2703_v39  ;;  %v3461_v39 = vstv %s2502_s21 }
 0x2d4   : > { %v882_v63 = vsel %vm815_vm2, %v3369_v13, 0.0  ;;  %v977_v33 = vpack.c.bf16 %v971_v31, %v970_v52 }
 0x2d5   : > { %2975 = vpow2.f32 %v862_v14  ;;  %883 = vadd.xlane.f32.xlu2 %v882_v63 }
 0x2d6   : > { %1073 = vrot.lane.b32.xlu1 %v3171_v25, %s3023_s19 }
 0x2d8   : > { %v2706_v11 = vpop.permute.xlu1 %2705  ;;  %v2691_v20 = vpop.permute.xlu2 %2690 }
 0x2d9   : > { %v2693_v45 = vunpack.i.h.bf16 %v2691_v20  ;;  %v2692_v53 = vunpack.i.l.bf16 %v2691_v20  ;;  %v2708_v35 = vunpack.i.h.bf16 %v2706_v11  ;;  %v2707_v36 = vunpack.i.l.bf16 %v2706_v11  ;;  %v2638_v11 = vld [vmem:[%s4067_s5 + $0x80] sm:$0xff] }
 0x2da   : > { %v3459_v20 = vstv %s1025_s20 }
 0x2db   : > { %v3377_v46 = vpop.eup %2975  ;;  %v972_v49 = vsel %vm567_vm0, %v2687_v47, %v2692_v53  ;;  %v973_v29 = vsel %vm567_vm0, %v2688_v15, %v2693_v45  ;;  %v2639_v47 = vld [vmem:[%s4067_s5 + $0x88] sm:$0xff] }
 0x2dc   : > { %v885_v25 = vsel %vm815_vm2, %v3377_v46, 0.0  ;;  %v978_v48 = vpack.c.bf16 %v973_v29, %v972_v49 }
 0x2dd   : > { %886 = vadd.xlane.f32.xlu0 %v885_v25 }
 0x2de   : > { %1001 = vmatpush.bf16.msrb.mxu1 %v978_v48  ;;  %2647 = vmatpush.bf16.msra.mxu2 %v978_v48 }
 0x2e0   : > { %v2711_v32 = vpop.permute.xlu1 %2710 }
 0x2e1   : > { %v2713_v37 = vunpack.i.h.bf16 %v2711_v32  ;;  %v2712_v38 = vunpack.i.l.bf16 %v2711_v32 }
 0x2e2   : > { %1002 = vmatpush.bf16.msrb.mxu1 %v977_v33  ;;  %2648 = vmatpush.bf16.msra.mxu2 %v977_v33 }
 0x2e3   : > { %v968_v40 = vsel %vm567_vm0, %v2707_v36, %v2712_v38  ;;  %v969_v51 = vsel %vm567_vm0, %v2708_v35, %v2713_v37 }
 0x2e4   : > { %v976_v41 = vpack.c.bf16 %v969_v51, %v968_v40 }
 0x2e6   : > { %1003 = vmatpush.bf16.msrb.mxu1 %v976_v41  ;;  %2649 = vmatpush.bf16.msra.mxu2 %v976_v41 }
 0x2ea   : > { %2105 = vmatpush.bf16.msra.mxu1 %v2639_v47 }
 0x2ed   : > { %1061 = vrot.lane.b32.xlu2 %v3132_v4, %s3023_s19 }
 0x2ee   : > { %2106 = vmatpush.bf16.msra.mxu1 %v2638_v11 }
 0x2f1   : > { %1063 = vrot.lane.b32.xlu0 %v3134_v5, %s3023_s19 }
 0x2f5   : > { %1067 = vrot.lane.b32.xlu2 %v3147_v12, %s3023_s19 }
 0x2f9   : > { %1069 = vrot.lane.b32.xlu0 %v3158_v18, %s3023_s19 }
 0x2fd   : > { %1075 = vrot.lane.b32.xlu2 %v3173_v26, %s3023_s19 }
 0x301   : > { %1071 = vrot.lane.b32.xlu0 %v3160_v19, %s3023_s19 }
 0x318   : > { %v866_v54 = vpop.xlane.xlu0 %865 }
 0x319   : > { %2977 = vrcp.f32 %v866_v54 }
 0x31f   : > { %v2978_v4 = vpop.eup %2977 }
 0x320   : > { %v869_v55 = vpop.xlane.xlu2 %868  ;;  %v896_v5 = vmul.f32 %v2978_v4, %v3336_v21 }
 0x321   : > { %2979 = vrcp.f32 %v869_v55 }
 0x327   : > { %v2980_v56 = vpop.eup %2979 }
 0x328   : > { %v897_v43 = vmul.f32 %v2980_v56, %v3342_v22  ;;  %v872_v58 = vpop.xlane.xlu1 %871 }
 0x329   : > { %2981 = vrcp.f32 %v872_v58 }
 0x32a   : > { %v980_v12 = vpack.c.bf16 %v897_v43, %v896_v5 }
 0x32c   : > { %2498 = vmatmul.msk.bf16.vlgmr.msrb.gmra.mxu1 %vm815_vm2, %v980_v12 }
 0x32f   : > { %v2982_v26 = vpop.eup %2981 }
 0x330   : > { %v875_v18 = vpop.xlane.xlu0 %874  ;;  %v898_v19 = vmul.f32 %v2982_v26, %v3346_v30 }
 0x331   : > { %2983 = vrcp.f32 %v875_v18 }
 0x337   : > { %v2984_v62 = vpop.eup %2983 }
 0x338   : > { %v899_v0 = vmul.f32 %v2984_v62, %v3350_v34  ;;  %v878_v6 = vpop.xlane.xlu2 %877 }
 0x339   : > { %2985 = vrcp.f32 %v878_v6 }
 0x33a   : > { %v981_v1 = vpack.c.bf16 %v899_v0, %v898_v19 }
 0x33c   : > { %2499 = vmatmul.msk.bf16.gmra.mxu1 %vm815_vm2, %v981_v1 }
 0x33f   : > { %v2986_v22 = vpop.eup %2985 }
 0x340   : > { %v881_v21 = vpop.xlane.xlu0 %880  ;;  %v900_v8 = vmul.f32 %v2986_v22, %v3357_v42  ;;  %v3024_v42 = vmov 0.0   ;;  %v1066_v5 = vpop.permute.xlu1 %1065 }
 0x341   : > { %2987 = vrcp.f32 %v881_v21  ;;  %1096 = vst.msk [vmem:[#allocation2 + $0x10] sm:$0xff] %vm567_vm0, %v3024_v42 }
 0x342   : > { %1097 = vst.msk [vmem:[#allocation2 + $0x18] sm:$0x3] %vm1094_vm3, %v3024_v42 }
 0x343   : > { %1093 = vst.msk [vmem:[#allocation2] sm:$0xff] %vm567_vm0, %v3024_v42 }
 0x344   : > { %1095 = vst.msk [vmem:[#allocation2 + $0x8] sm:$0x3] %vm1094_vm3, %v3024_v42 }
 0x345   : > { %1098 = vst.msk [vmem:[#allocation2 + $0x20] sm:$0xff] %vm567_vm0, %v3024_v42 }
 0x346   : > { %1099 = vst.msk [vmem:[#allocation2 + $0x28] sm:$0x3] %vm1094_vm3, %v3024_v42 }
 0x347   : > { %v2988_v7 = vpop.eup %2987  ;;  %1100 = vst.msk [vmem:[#allocation2 + $0x30] sm:$0xff] %vm567_vm0, %v3024_v42 }
 0x348   : > { %v901_v61 = vmul.f32 %v2988_v7, %v3362_v44  ;;  %v884_v59 = vpop.xlane.xlu2 %883  ;;  %1101 = vst.msk [vmem:[#allocation2 + $0x38] sm:$0x3] %vm1094_vm3, %v3024_v42 }
 0x349   : > { %2989 = vrcp.f32 %v884_v59  ;;  %1102 = vst.msk [vmem:[#allocation2 + $0x40] sm:$0xff] %vm567_vm0, %v3024_v42 }
 0x34a   : > { %v982_v57 = vpack.c.bf16 %v901_v61, %v900_v8  ;;  %1103 = vst.msk [vmem:[#allocation2 + $0x48] sm:$0x3] %vm1094_vm3, %v3024_v42 }
 0x34b   : > { %1104 = vst.msk [vmem:[#allocation2 + $0x50] sm:$0xff] %vm567_vm0, %v3024_v42  ;;  %v1131_v44 = vld [vmem:[#allocation2 + $0x1] sm:$0xff] }
 0x34c   : > { %2500 = vmatmul.msk.bf16.vlgmr.msra.gmra.mxu2 %vm815_vm2, %v982_v57  ;;  %1105 = vst.msk [vmem:[#allocation2 + $0x58] sm:$0x3] %vm1094_vm3, %v3024_v42 }
 0x34d   : > { %1106 = vst.msk [vmem:[#allocation2 + $0x60] sm:$0xff] %vm567_vm0, %v3024_v42 }
 0x34e   : > { %1107 = vst.msk [vmem:[#allocation2 + $0x68] sm:$0x3] %vm1094_vm3, %v3024_v42 }
 0x34f   : > { %v2990_v34 = vpop.eup %2989  ;;  %1108 = vst.msk [vmem:[#allocation2 + $0x70] sm:$0xff] %vm567_vm0, %v3024_v42 }
 0x350   : > { %v887_v30 = vpop.xlane.xlu0 %886  ;;  %v902_v14 = vmul.f32 %v2990_v34, %v3369_v13  ;;  %1109 = vst.msk [vmem:[#allocation2 + $0x78] sm:$0x3] %vm1094_vm3, %v3024_v42  ;;  %v1139_v13 = vld [vmem:[#allocation2 + $0x2] sm:$0xff]  ;;  %v1062_v45 = vpop.permute.xlu2 %1061 }
 0x351   : > { %2991 = vrcp.f32 %v887_v30  ;;  %1110 = vst.msk [vmem:[#allocation2 + $0x80] sm:$0xff] %vm567_vm0, %v3024_v42 }
 0x352   : > { %1111 = vst.msk [vmem:[#allocation2 + $0x88] sm:$0x3] %vm1094_vm3, %v3024_v42 }
 0x353   : > { %1112 = vst.msk [vmem:[#allocation2 + $0x90] sm:$0xff] %vm567_vm0, %v3024_v42 }
 0x354   : > { %1113 = vst.msk [vmem:[#allocation2 + $0x98] sm:$0x3] %vm1094_vm3, %v3024_v42 }
 0x355   : > { %1438 = vst.msk [vmem:[#allocation2 + $0x8] sm:$0x3] %vm1094_vm3, %v3024_v42 }
 0x357   : > { %v2992_v60 = vpop.eup %2991 }
 0x358   : > { %v903_v63 = vmul.f32 %v2992_v60, %v3377_v46  ;;  %v1068_v59 = vpop.permute.xlu2 %1067 }
 0x35a   : > { %v983_v15 = vpack.c.bf16 %v903_v63, %v902_v14  ;;  %v3536_v34 = vld [vmem:[#allocation2 + $0x90] sm:$0xff] }
 0x35b   : > { %v3534_v30 = vld [vmem:[#allocation2 + $0x92] sm:$0xff] }
 0x35c   : > { %2501 = vmatmul.msk.bf16.gmra.mxu2 %vm815_vm2, %v983_v15  ;;  %v3538_v60 = vld [vmem:[#allocation2 + $0x91] sm:$0xff] }
 0x35d   : > { %1455 = vst.msk [vmem:[#allocation2 + $0x90] sm:$0xff] %vm567_vm0, %v3024_v42 }
 0x35e   : > { %1456 = vst.msk [vmem:[#allocation2 + $0x98] sm:$0x3] %vm1094_vm3, %v3024_v42 }
 0x363   : > { %v1064_v29 = vpop.permute.xlu0 %1063 }
 0x3a9   : > { %v1005_v50 = vpop.f32.mrf.mxu1 }
 0x3aa   : > { %v1028_v53 = vmul.f32 %v3459_v20, %v1005_v50  ;;  %v1045_v46 = vmul.f32 %v3461_v39, %v1005_v50 }
 0x3ac   : > { %v1036_v27 = vadd.f32 %v1028_v53, %v3128_v2  ;;  %v1085_v28 = vadd.f32 %v1062_v45, %v1045_v46  ;;  %v1070_v45 = vpop.permute.xlu0 %1069 }
 0x3ae   : > { %1115 = vst.msk [vmem:[#allocation2 + $0x11] sm:$0xff] %vm567_vm0, %v1036_v27  ;;  %1465 = vrot.lane.b32.xlu0 %v1085_v28, %s3022_s18 }
 0x3b1   : > { %v1007_v49 = vpop.f32.mrf.mxu1 }
 0x3b2   : > { %v1029_v25 = vmul.f32 %v3459_v20, %v1007_v49  ;;  %v1046_v48 = vmul.f32 %v3461_v39, %v1007_v49 }
 0x3b4   : > { %v1037_v52 = vadd.f32 %v1029_v25, %v3130_v3  ;;  %v1086_v31 = vadd.f32 %v1064_v29, %v1046_v48 }
 0x3b5   : > { %v3471_v32 = vld [vmem:[#allocation2 + $0x11] sm:$0xff] }
 0x3b6   : > { %1116 = vst.msk [vmem:[#allocation2 + $0x21] sm:$0xff] %vm567_vm0, %v1037_v52  ;;  %1467 = vrot.lane.b32.xlu1 %v1086_v31, %s3022_s18  ;;  %v2714_v2 = vpack.i.bf16 %v3471_v32, %v1131_v44  ;;  %v1140_v33 = vld [vmem:[#allocation2 + $0x12] sm:$0xff] }
 0x3b7   : > { %1440 = vst.msk [vmem:[#allocation2 + $0x18] sm:$0x3] %vm1094_vm3, %v3024_v42  ;;  %v3478_v35 = vld [vmem:[#allocation2 + $0x10] sm:$0xff]  ;;  %v2719_v51 = vpack.i.bf16 %v1140_v33, %v1139_v13 }
 0x3b8   : > { %2715 = vrot.lane.b32.xlu2 %v2714_v2, %s3023_s19  ;;  %1439 = vst.msk [vmem:[#allocation2 + $0x10] sm:$0xff] %vm567_vm0, %v3024_v42 }
 0x3b9   : > { %v1010_v3 = vpop.f32.mrf.mxu1 }
 0x3ba   : > { %v1030_v36 = vmul.f32 %v3459_v20, %v1010_v3  ;;  %v1047_v56 = vmul.f32 %v3461_v39, %v1010_v3 }
 0x3bc   : > { %v1038_v37 = vadd.f32 %v1030_v36, %v3141_v9  ;;  %v1087_v0 = vadd.f32 %v1066_v5, %v1047_v56  ;;  %v1072_v36 = vpop.permute.xlu0 %1071 }
 0x3bd   : > { %v1164_v38 = vld [vmem:[#allocation2 + $0x22] sm:$0xff] }
 0x3be   : > { %v3485_v40 = vld [vmem:[#allocation2 + $0x20] sm:$0xff]  ;;  %1117 = vst.msk [vmem:[#allocation2 + $0x31] sm:$0xff] %vm567_vm0, %v1038_v37  ;;  %v2724_v41 = vpack.i.bf16 %v1164_v38, %v1140_v33 }
 0x3bf   : > { %v2729_v54 = vpack.i.bf16 %v3485_v40, %v3478_v35  ;;  %v3490_v55 = vld [vmem:[#allocation2 + $0x21] sm:$0xff] }
 0x3c0   : > { %1441 = vst.msk [vmem:[#allocation2 + $0x20] sm:$0xff] %vm567_vm0, %v3024_v42  ;;  %2720 = vrot.lane.b32.xlu2 %v2719_v51, %s3025_s27  ;;  %2725 = vrot.lane.b32.xlu0 %v2724_v41, %s3023_s19 }
 0x3c1   : > { %1442 = vst.msk [vmem:[#allocation2 + $0x28] sm:$0x3] %vm1094_vm3, %v3024_v42  ;;  %2730 = vrot.lane.b32.xlu1 %v2729_v54, %s3022_s18  ;;  %v1012_v9 = vpop.f32.mrf.mxu1 }
 0x3c2   : > { %v1031_v4 = vmul.f32 %v3459_v20, %v1012_v9  ;;  %v1048_v57 = vmul.f32 %v3461_v39, %v1012_v9 }
 0x3c4   : > { %v1039_v43 = vadd.f32 %v1031_v4, %v3143_v10 }
 0x3c5   : > { %v1189_v12 = vld [vmem:[#allocation2 + $0x32] sm:$0xff] }
 0x3c6   : > { %v3502_v58 = vld [vmem:[#allocation2 + $0x31] sm:$0xff]  ;;  %1118 = vst.msk [vmem:[#allocation2 + $0x41] sm:$0xff] %vm567_vm0, %v1039_v43  ;;  %v1811_v26 = vpack.c.bf16 %v1189_v12, %v1164_v38  ;;  %v2749_v7 = vpack.i.bf16 %v1189_v12, %v1164_v38 }
 0x3c7   : > { %v3504_v18 = vld [vmem:[#allocation2 + $0x30] sm:$0xff]  ;;  %v2739_v62 = vpack.i.bf16 %v3502_v58, %v3490_v55  ;;  %1444 = vst.msk [vmem:[#allocation2 + $0x38] sm:$0x3] %vm1094_vm3, %v3024_v42 }
 0x3c8   : > { %v2734_v19 = vpack.i.bf16 %v3504_v18, %v3485_v40  ;;  %1443 = vst.msk [vmem:[#allocation2 + $0x30] sm:$0xff] %vm567_vm0, %v3024_v42  ;;  %2575 = vmatmul.msk.bf16.vlgmr.msra.gmra.mxu1 %vm567_vm0, %v1811_v26 }
 0x3c9   : > { %2740 = vrot.lane.b32.xlu2 %v2739_v62, %s3022_s18  ;;  %1469 = vrot.lane.b32.xlu1 %v1087_v0, %s3022_s18 }
 0x3ca   : > { %2735 = vrot.lane.b32.xlu0 %v2734_v19, %s3025_s27 }
 0x3cd   : > { %v3519_v10 = vld [vmem:[#allocation2 + $0x40] sm:$0xff] }
 0x3ce   : > { %v1166_v1 = vld [vmem:[#allocation2 + $0x42] sm:$0xff]  ;;  %v2759_v14 = vpack.i.bf16 %v3519_v10, %v3504_v18 }
 0x3cf   : > { %v3521_v6 = vld [vmem:[#allocation2 + $0x41] sm:$0xff]  ;;  %v2754_v21 = vpack.i.bf16 %v1166_v1, %v1189_v12  ;;  %v1015_v22 = vpop.f32.mrf.mxu2 }
 0x3d0   : > { %1445 = vst.msk [vmem:[#allocation2 + $0x40] sm:$0xff] %vm567_vm0, %v3024_v42  ;;  %v1032_v8 = vmul.f32 %v3459_v20, %v1015_v22  ;;  %v1049_v13 = vmul.f32 %v3461_v39, %v1015_v22  ;;  %v2637_v22 = vld [vmem:[%s4067_s5 + $0x78] sm:$0xff] }
 0x3d1   : > { %1446 = vst.msk [vmem:[#allocation2 + $0x48] sm:$0x3] %vm1094_vm3, %v3024_v42  ;;  %2745 = vrot.lane.b32.xlu2 %v2739_v62, %s3023_s19  ;;  %2750 = vrot.lane.b32.xlu1 %v2749_v7, %s3025_s27  ;;  %v2629_v62 = vld [vmem:[%s4067_s5 + $0x38] sm:$0xff]  ;;  %v2626_v7 = vld [vmem:[%s4067_s5 + $0x20] sm:$0xff] }
 0x3d2   : > { %2755 = vrot.lane.b32.xlu0 %v2754_v21, %s3023_s19  ;;  %v1040_v61 = vadd.f32 %v1032_v8, %v3154_v16  ;;  %v1088_v16 = vadd.f32 %v1068_v59, %v1048_v57  ;;  %v1089_v27 = vadd.f32 %v1070_v45, %v1049_v13  ;;  %2001 = vmatpush.bf16.msra.mxu3 %v2629_v62  ;;  %v2627_v21 = vld [vmem:[%s4067_s5 + $0x28] sm:$0xff]  ;;  %v2636_v8 = vld [vmem:[%s4067_s5 + $0x70] sm:$0xff]  ;;  %v2633_v13 = vld [vmem:[%s4067_s5 + $0x58] sm:$0xff] }
 0x3d3   : > { %2050 = vmatpush.bf16.msrb.mxu2 %v2637_v22 }
 0x3d4   : > { %1119 = vst.msk [vmem:[#allocation2 + $0x51] sm:$0xff] %vm567_vm0, %v1040_v61 }
 0x3d7   : > { %v1017_v63 = vpop.f32.mrf.mxu2  ;;  %2051 = vmatpush.bf16.msrb.mxu2 %v2636_v8 }
 0x3d8   : > { %v1033_v15 = vmul.f32 %v3459_v20, %v1017_v63 }
 0x3d9   : > { %2760 = vrot.lane.b32.xlu2 %v2759_v14, %s3022_s18  ;;  %1471 = vrot.lane.b32.xlu1 %v1088_v16, %s3022_s18  ;;  %v1074_v14 = vpop.permute.xlu1 %1073  ;;  %v1076_v16 = vpop.permute.xlu2 %1075 }
 0x3da   : > { %v1041_v44 = vadd.f32 %v1033_v15, %v3156_v17  ;;  %v2634_v15 = vld [vmem:[%s4067_s5 + $0x60] sm:$0xff] }
 0x3db   : > { %v1191_v47 = vld [vmem:[#allocation2 + $0x52] sm:$0xff] }
 0x3dc   : > { %v3551_v11 = vld [vmem:[#allocation2 + $0x51] sm:$0xff]  ;;  %1120 = vst.msk [vmem:[#allocation2 + $0x61] sm:$0xff] %vm567_vm0, %v1041_v44  ;;  %v1814_v53 = vpack.c.bf16 %v1191_v47, %v1166_v1  ;;  %v2779_v31 = vpack.i.bf16 %v1191_v47, %v1166_v1  ;;  %v2623_v44 = vld [vmem:[%s4067_s5 + $0x8] sm:$0xff] }
 0x3dd   : > { %v3553_v50 = vld [vmem:[#allocation2 + $0x50] sm:$0xff]  ;;  %v2769_v46 = vpack.i.bf16 %v3551_v11, %v3521_v6  ;;  %1448 = vst.msk [vmem:[#allocation2 + $0x58] sm:$0x3] %vm1094_vm3, %v3024_v42 }
 0x3de   : > { %1447 = vst.msk [vmem:[#allocation2 + $0x50] sm:$0xff] %vm567_vm0, %v3024_v42  ;;  %2576 = vmatmul.msk.bf16.gmra.mxu1 %vm567_vm0, %v1814_v53  ;;  %v2764_v17 = vpack.i.bf16 %v3553_v50, %v3519_v10 }
 0x3df   : > { %2770 = vrot.lane.b32.xlu0 %v2769_v46, %s3022_s18  ;;  %v3566_v28 = vpop.f32.mrf.mxu2 }
 0x3e0   : > { %v1034_v49 = vmul.f32 %v3459_v20, %v3566_v28  ;;  %v1051_v59 = vmul.f32 %v3461_v39, %v3566_v28  ;;  %v2630_v28 = vld [vmem:[%s4067_s5 + $0x40] sm:$0xff] }
 0x3e1   : > { %2765 = vrot.lane.b32.xlu2 %v2764_v17, %s3025_s27  ;;  %1473 = vrot.lane.b32.xlu1 %v1089_v27, %s3022_s18  ;;  %v2632_v17 = vld [vmem:[%s4067_s5 + $0x50] sm:$0xff] }
 0x3e2   : > { %v1042_v29 = vadd.f32 %v1034_v49, %v3167_v23  ;;  %v1050_v23 = vmul.f32 %v3461_v39, %v1017_v63  ;;  %v2624_v63 = vld [vmem:[%s4067_s5 + $0x10] sm:$0xff] }
 0x3e3   : > { %v1168_v25 = vld [vmem:[#allocation2 + $0x62] sm:$0xff] }
 0x3e4   : > { %1121 = vst.msk [vmem:[#allocation2 + $0x71] sm:$0xff] %vm567_vm0, %v1042_v29  ;;  %v3574_v48 = vld [vmem:[#allocation2 + $0x60] sm:$0xff]  ;;  %v2784_v33 = vpack.i.bf16 %v1168_v25, %v1191_v47  ;;  %v1090_v51 = vadd.f32 %v1072_v36, %v1050_v23 }
 0x3e5   : > { %v3576_v52 = vld [vmem:[#allocation2 + $0x61] sm:$0xff] }
 0x3e6   : > { %1449 = vst.msk [vmem:[#allocation2 + $0x60] sm:$0xff] %vm567_vm0, %v3024_v42 }
 0x3e7   : > { %2775 = vrot.lane.b32.xlu0 %v2769_v46, %s3023_s19  ;;  %1450 = vst.msk [vmem:[#allocation2 + $0x68] sm:$0x3] %vm1094_vm3, %v3024_v42  ;;  %v3583_v2 = vpop.f32.mrf.mxu2  ;;  %v2622_v46 = vld [vmem:[%s4067_s5] sm:$0xff] }
 0x3e8   : > { %v1035_v3 = vmul.f32 %v3459_v20, %v3583_v2  ;;  %v2789_v20 = vpack.i.bf16 %v3574_v48, %v3553_v50  ;;  %v1052_v47 = vmul.f32 %v3461_v39, %v3583_v2  ;;  %v2631_v39 = vld [vmem:[%s4067_s5 + $0x48] sm:$0xff] }
 0x3e9   : > { %2780 = vrot.lane.b32.xlu2 %v2779_v31, %s3025_s27  ;;  %2785 = vrot.lane.b32.xlu1 %v2784_v33, %s3023_s19 }
 0x3ea   : > { %v1043_v37 = vadd.f32 %v1035_v3, %v3169_v24  ;;  %v3602_v24 = vld [vmem:[#allocation2] sm:$0xff]  ;;  %v1092_v53 = vadd.f32 %v1076_v16, %v1052_v47 }
 0x3eb   : > { %v1193_v38 = vld [vmem:[#allocation2 + $0x72] sm:$0xff]  ;;  %1437 = vst.msk [vmem:[#allocation2] sm:$0xff] %vm567_vm0, %v3024_v42 }
 0x3ec   : > { %1122 = vst.msk [vmem:[#allocation2 + $0x81] sm:$0xff] %vm567_vm0, %v1043_v37  ;;  %v1817_v41 = vpack.c.bf16 %v1193_v38, %v1168_v25  ;;  %v3592_v54 = vld [vmem:[#allocation2 + $0x70] sm:$0xff]  ;;  %v2809_v4 = vpack.i.bf16 %v1193_v38, %v1168_v25 }
 0x3ed   : > { %v3594_v9 = vld [vmem:[#allocation2 + $0x71] sm:$0xff]  ;;  %v2794_v43 = vpack.i.bf16 %v3592_v54, %v3574_v48 }
 0x3ee   : > { %1451 = vst.msk [vmem:[#allocation2 + $0x70] sm:$0xff] %vm567_vm0, %v3024_v42  ;;  %2577 = vmatmul.msk.bf16.gmra.mxu1 %vm567_vm0, %v1817_v41  ;;  %v2804_v26 = vpack.i.bf16 %v3594_v9, %v3576_v52 }
 0x3ef   : > { %1475 = vrot.lane.b32.xlu0 %v1090_v51, %s3022_s18  ;;  %1452 = vst.msk [vmem:[#allocation2 + $0x78] sm:$0x3] %vm1094_vm3, %v3024_v42 }
 0x3f1   : > { %2790 = vrot.lane.b32.xlu2 %v2789_v20, %s3022_s18  ;;  %2810 = vrot.lane.b32.xlu1 %v2809_v4, %s3025_s27 }
 0x3f2   : > { %v1505_v25 = vld [vmem:[#allocation2 + $0x1] sm:$0xff] }
 0x3f3   : > { %v1194_v56 = vld [vmem:[#allocation2 + $0x82] sm:$0xff] }
 0x3f4   : > { %v3610_v5 = vld [vmem:[#allocation2 + $0x81] sm:$0xff]  ;;  %v1820_v0 = vpack.c.bf16 %v3534_v30, %v1194_v56  ;;  %v2814_v61 = vpack.i.bf16 %v1194_v56, %v1193_v38  ;;  %v2625_v30 = vld [vmem:[%s4067_s5 + $0x18] sm:$0xff] }
 0x3f5   : > { %v1154_v12 = vld [vmem:[#allocation2 + $0x80] sm:$0xff]  ;;  %1454 = vst.msk [vmem:[#allocation2 + $0x88] sm:$0x3] %vm1094_vm3, %v3024_v42  ;;  %v2829_v57 = vpack.i.bf16 %v3538_v60, %v3610_v5  ;;  %v1091_v60 = vadd.f32 %v1074_v14, %v1051_v59 }
 0x3f6   : > { %1453 = vst.msk [vmem:[#allocation2 + $0x80] sm:$0xff] %vm567_vm0, %v3024_v42  ;;  %v2824_v19 = vpack.i.bf16 %v1154_v12, %v3592_v54  ;;  %v2628_v42 = vld [vmem:[%s4067_s5 + $0x30] sm:$0xff]  ;;  %v2819_v1 = vpack.i.bf16 %v3536_v34, %v1154_v12  ;;  %v2635_v34 = vld [vmem:[%s4067_s5 + $0x68] sm:$0xff] }
 0x3f7   : > { %2795 = vrot.lane.b32.xlu0 %v2794_v43, %s3025_s27  ;;  %2002 = vmatpush.bf16.msra.mxu3 %v2628_v42  ;;  %v1513_v23 = vld [vmem:[#allocation2 + $0x2] sm:$0xff] }
 0x3f8   : > { %2052 = vmatpush.bf16.msrb.mxu2 %v2635_v34 }
 0x3f9   : > { %2805 = vrot.lane.b32.xlu2 %v2804_v26, %s3023_s19  ;;  %2825 = vrot.lane.b32.xlu1 %v2824_v19, %s3022_s18 }
 0x3fb   : > { %2003 = vmatpush.bf16.msra.mxu3 %v2627_v21 }
 0x3fc   : > { %2053 = vmatpush.bf16.msrb.mxu2 %v2634_v15 }
 0x3fe   : > { %2578 = vmatmul.msk.bf16.gmra.mxu1 %vm567_vm0, %v1820_v0 }
 0x3ff   : > { %2800 = vrot.lane.b32.xlu0 %v2804_v26, %s3022_s18  ;;  %2004 = vmatpush.bf16.msra.mxu3 %v2626_v7 }
 0x400   : > { %2054 = vmatpush.bf16.msrb.mxu2 %v2633_v13 }
 0x401   : > { %2820 = vrot.lane.b32.xlu2 %v2819_v1, %s3025_s27 }
 0x403   : > { %2005 = vmatpush.bf16.msra.mxu3 %v2625_v30 }
 0x404   : > { %2055 = vmatpush.bf16.msrb.mxu2 %v2632_v17 }
 0x407   : > { %2815 = vrot.lane.b32.xlu0 %v2814_v61, %s3023_s19  ;;  %2006 = vmatpush.bf16.msra.mxu3 %v2624_v63 }
 0x408   : > { %2056 = vmatpush.bf16.msrb.mxu2 %v2631_v39 }
 0x409   : > { %2830 = vrot.lane.b32.xlu2 %v2829_v57, %s3022_s18 }
 0x40b   : > { %2007 = vmatpush.bf16.msra.mxu3 %v2623_v44 }
 0x40c   : > { %2057 = vmatpush.bf16.msrb.mxu2 %v2630_v28 }
 0x40f   : > { %1477 = vrot.lane.b32.xlu0 %v1091_v60, %s3022_s18  ;;  %2008 = vmatpush.bf16.msra.mxu3 %v2622_v46 }
 0x412   : > { %v2716_v45 = vpop.permute.xlu2 %2715 }
 0x413   : > { %v2718_v36 = vunpack.i.h.bf16 %v2716_v45  ;;  %v2717_v37 = vunpack.i.l.bf16 %v2716_v45 }
 0x415   : > { %v1388_v42 = vsel %vm567_vm0, %v3602_v24, %v2717_v37  ;;  %v1389_v0 = vsel %vm567_vm0, %v3478_v35, %v2718_v36 }
 0x417   : > { %1479 = vrot.lane.b32.xlu0 %v1092_v53, %s3022_s18 }
 0x41a   : > { %v2721_v27 = vpop.permute.xlu2 %2720 }
 0x41b   : > { %v2723_v38 = vunpack.i.h.bf16 %v2721_v27  ;;  %v2722_v56 = vunpack.i.l.bf16 %v2721_v27 }
 0x41d   : > { %v1396_v22 = vsel %vm815_vm2, %v1388_v42, %v2722_v56  ;;  %v1397_v7 = vsel %vm815_vm2, %v1389_v0, %v2723_v38 }
 0x420   : > { %v1466_v49 = vpop.permute.xlu0 %1465 }
 0x421   : > { %1489 = vst.msk [vmem:[#allocation2 + $0x11] sm:$0xff] %vm567_vm0, %v1466_v49 }
 0x423   : > { %v2741_v29 = vpop.permute.xlu2 %2740 }
 0x424   : > { %v2743_v60 = vunpack.i.h.bf16 %v2741_v29  ;;  %v2742_v63 = vunpack.i.l.bf16 %v2741_v29 }
 0x428   : > { %v1468_v31 = vpop.permute.xlu1 %1467  ;;  %v3688_v2 = vld [vmem:[#allocation2 + $0x11] sm:$0xff] }
 0x429   : > { %v2834_v33 = vpack.i.bf16 %v3688_v2, %v1505_v25  ;;  %1490 = vst.msk [vmem:[#allocation2 + $0x21] sm:$0xff] %vm567_vm0, %v1468_v31  ;;  %v1514_v3 = vld [vmem:[#allocation2 + $0x12] sm:$0xff] }
 0x42a   : > { %v3695_v20 = vld [vmem:[#allocation2 + $0x10] sm:$0xff]  ;;  %v2839_v43 = vpack.i.bf16 %v1514_v3, %v1513_v23 }
 0x42b   : > { %2835 = vrot.lane.b32.xlu1 %v2834_v33, %s3023_s19  ;;  %v2746_v51 = vpop.permute.xlu2 %2745 }
 0x42c   : > { %v2747_v45 = vunpack.i.l.bf16 %v2746_v51  ;;  %v2748_v17 = vunpack.i.h.bf16 %v2746_v51 }
 0x42e   : > { %v1390_v27 = vsel %vm567_vm0, %v3485_v40, %v2747_v45  ;;  %v1391_v29 = vsel %vm567_vm0, %v3504_v18, %v2748_v17 }
 0x430   : > { %v3693_v41 = vld [vmem:[#allocation2 + $0x22] sm:$0xff] }
 0x431   : > { %v3697_v4 = vld [vmem:[#allocation2 + $0x20] sm:$0xff]  ;;  %v2844_v12 = vpack.i.bf16 %v3693_v41, %v1514_v3 }
 0x432   : > { %v2849_v26 = vpack.i.bf16 %v3697_v4, %v3695_v20  ;;  %v2726_v62 = vpop.permute.xlu0 %2725  ;;  %v3730_v23 = vld [vmem:[#allocation2 + $0x21] sm:$0xff] }
 0x433   : > { %v2731_v19 = vpop.permute.xlu1 %2730  ;;  %2840 = vrot.lane.b32.xlu1 %v2839_v43, %s3025_s27  ;;  %2845 = vrot.lane.b32.xlu2 %v2844_v12, %s3023_s19  ;;  %v2728_v59 = vunpack.i.h.bf16 %v2726_v62  ;;  %v2727_v30 = vunpack.i.l.bf16 %v2726_v62  ;;  %v2761_v24 = vpop.permute.xlu2 %2760 }
 0x434   : > { %v2733_v1 = vunpack.i.h.bf16 %v2731_v19  ;;  %v2732_v21 = vunpack.i.l.bf16 %v2731_v19  ;;  %2850 = vrot.lane.b32.xlu0 %v2849_v26, %s3022_s18  ;;  %v2763_v25 = vunpack.i.h.bf16 %v2761_v24  ;;  %v2762_v3 = vunpack.i.l.bf16 %v2761_v24 }
 0x435   : > { %v1413_v15 = vsel %vm567_vm0, %v3471_v32, %v2727_v30  ;;  %v1414_v44 = vsel %vm567_vm0, %v3490_v55, %v2728_v59 }
 0x436   : > { %v1405_v8 = vsel %vm1404_vm4, %v1396_v22, %v2732_v21  ;;  %v1406_v61 = vsel %vm1404_vm4, %v1397_v7, %v2733_v1 }
 0x437   : > { %v1809_v57 = vpack.c.bf16 %v1406_v61, %v1405_v8 }
 0x439   : > { %2009 = vmatmul.bf16.vlgmr.msra.gmra.mxu3 %v1809_v57 }
 0x43b   : > { %v1470_v34 = vpop.permute.xlu1 %1469  ;;  %v2766_v36 = vpop.permute.xlu2 %2765 }
 0x43c   : > { %v2736_v14 = vpop.permute.xlu0 %2735  ;;  %1491 = vst.msk [vmem:[#allocation2 + $0x31] sm:$0xff] %vm567_vm0, %v1470_v34  ;;  %v2768_v7 = vunpack.i.h.bf16 %v2766_v36  ;;  %v2767_v8 = vunpack.i.l.bf16 %v2766_v36 }
 0x43d   : > { %v2738_v35 = vunpack.i.h.bf16 %v2736_v14  ;;  %v2737_v16 = vunpack.i.l.bf16 %v2736_v14 }
 0x43f   : > { %v1422_v13 = vsel %vm815_vm2, %v1414_v44, %v2738_v35  ;;  %v1421_v47 = vsel %vm815_vm2, %v1413_v15, %v2737_v16 }
 0x440   : > { %v1429_v53 = vsel %vm1404_vm4, %v1421_v47, %v2742_v63  ;;  %v1430_v46 = vsel %vm1404_vm4, %v1422_v13, %v2743_v60 }
 0x441   : > { %v1810_v39 = vpack.c.bf16 %v1430_v46, %v1429_v53 }
 0x443   : > { %2058 = vmatmul.bf16.vlgmr.msrb.gmra.mxu2 %v1810_v39  ;;  %v2751_v28 = vpop.permute.xlu1 %2750  ;;  %v3724_v32 = vld [vmem:[#allocation2 + $0x31] sm:$0xff]  ;;  %v2781_v22 = vpop.permute.xlu2 %2780 }
 0x444   : > { %v1562_v49 = vld [vmem:[#allocation2 + $0x32] sm:$0xff]  ;;  %v2753_v31 = vunpack.i.h.bf16 %v2751_v28  ;;  %v2752_v33 = vunpack.i.l.bf16 %v2751_v28  ;;  %v2859_v37 = vpack.i.bf16 %v3724_v32, %v3730_v23  ;;  %v2756_v12 = vpop.permute.xlu0 %2755  ;;  %v2783_v47 = vunpack.i.h.bf16 %v2781_v22 }
 0x445   : > { %v3726_v55 = vld [vmem:[#allocation2 + $0x30] sm:$0xff]  ;;  %v1823_v40 = vpack.c.bf16 %v1562_v49, %v3693_v41  ;;  %v2758_v62 = vunpack.i.h.bf16 %v2756_v12  ;;  %v2757_v19 = vunpack.i.l.bf16 %v2756_v12  ;;  %v2869_v0 = vpack.i.bf16 %v1562_v49, %v3693_v41 }
 0x446   : > { %v2854_v38 = vpack.i.bf16 %v3726_v55, %v3697_v4  ;;  %v1398_v51 = vsel %vm815_vm2, %v1390_v27, %v2752_v33  ;;  %v1399_v56 = vsel %vm815_vm2, %v1391_v29, %v2753_v31  ;;  %2860 = vrot.lane.b32.xlu1 %v2859_v37, %s3022_s18  ;;  %v2782_v45 = vunpack.i.l.bf16 %v2781_v22 }
 0x447   : > { %2579 = vmatmul.msk.bf16.gmra.mxu1 %vm567_vm0, %v1823_v40  ;;  %v1407_v18 = vsel %vm1404_vm4, %v1398_v51, %v2762_v3  ;;  %v1408_v43 = vsel %vm1404_vm4, %v1399_v56, %v2763_v25  ;;  %v1415_v1 = vsel %vm567_vm0, %v3502_v58, %v2757_v19  ;;  %v1416_v21 = vsel %vm567_vm0, %v3521_v6, %v2758_v62 }
 0x448   : > { %2855 = vrot.lane.b32.xlu2 %v2854_v38, %s3025_s27  ;;  %v1812_v26 = vpack.c.bf16 %v1408_v43, %v1407_v18  ;;  %v1423_v30 = vsel %vm815_vm2, %v1415_v1, %v2767_v8  ;;  %v1424_v41 = vsel %vm815_vm2, %v1416_v21, %v2768_v7 }
 0x44a   : > { %2014 = vmatmul.bf16.gmra.mxu3 %v1812_v26 }
 0x44b   : > { %v1472_v42 = vpop.permute.xlu1 %1471  ;;  %v2791_v60 = vpop.permute.xlu2 %2790 }
 0x44c   : > { %1492 = vst.msk [vmem:[#allocation2 + $0x41] sm:$0xff] %vm567_vm0, %v1472_v42  ;;  %v2792_v29 = vunpack.i.l.bf16 %v2791_v60 }
 0x44e   : > { %2870 = vrot.lane.b32.xlu1 %v2869_v0, %s3025_s27 }
 0x450   : > { %2865 = vrot.lane.b32.xlu2 %v2859_v37, %s3023_s19 }
 0x451   : > { %v2771_v61 = vpop.permute.xlu0 %2770 }
 0x452   : > { %v2773_v57 = vunpack.i.h.bf16 %v2771_v61  ;;  %v2772_v59 = vunpack.i.l.bf16 %v2771_v61 }
 0x453   : > { %v1474_v24 = vpop.permute.xlu1 %1473  ;;  %v1540_v34 = vld [vmem:[#allocation2 + $0x42] sm:$0xff]  ;;  %v2806_v56 = vpop.permute.xlu2 %2805 }
 0x454   : > { %v1431_v58 = vsel %vm1404_vm4, %v1423_v30, %v2772_v59  ;;  %v1432_v6 = vsel %vm1404_vm4, %v1424_v41, %v2773_v57  ;;  %v2874_v14 = vpack.i.bf16 %v1540_v34, %v1562_v49  ;;  %1493 = vst.msk [vmem:[#allocation2 + $0x51] sm:$0xff] %vm567_vm0, %v1474_v24  ;;  %v3758_v44 = vld [vmem:[#allocation2 + $0x41] sm:$0xff]  ;;  %v2793_v49 = vunpack.i.h.bf16 %v2791_v60 }
 0x455   : > { %v1813_v35 = vpack.c.bf16 %v1432_v6, %v1431_v58  ;;  %v3760_v13 = vld [vmem:[#allocation2 + $0x40] sm:$0xff]  ;;  %v2808_v43 = vunpack.i.h.bf16 %v2806_v56  ;;  %v2807_v12 = vunpack.i.l.bf16 %v2806_v56 }
 0x456   : > { %2875 = vrot.lane.b32.xlu0 %v2874_v14, %s3023_s19 }
 0x457   : > { %2063 = vmatmul.bf16.gmra.mxu2 %v1813_v35  ;;  %v1395_v1 = vsel %vm567_vm0, %v3592_v54, %v2808_v43  ;;  %v1394_v22 = vsel %vm567_vm0, %v3574_v48, %v2807_v12 }
 0x459   : > { %v2776_v16 = vpop.permute.xlu0 %2775 }
 0x45a   : > { %v2778_v63 = vunpack.i.h.bf16 %v2776_v16  ;;  %v2777_v15 = vunpack.i.l.bf16 %v2776_v16 }
 0x45b   : > { %v2786_v17 = vpop.permute.xlu1 %2785  ;;  %v1564_v39 = vld [vmem:[#allocation2 + $0x52] sm:$0xff] }
 0x45c   : > { %v1393_v53 = vsel %vm567_vm0, %v3553_v50, %v2778_v63  ;;  %v1392_v46 = vsel %vm567_vm0, %v3519_v10, %v2777_v15  ;;  %v3766_v27 = vld [vmem:[#allocation2 + $0x51] sm:$0xff]  ;;  %v1826_v25 = vpack.c.bf16 %v1564_v39, %v1540_v34  ;;  %v2879_v50 = vpack.i.bf16 %v3760_v13, %v3726_v55  ;;  %v2821_v15 = vpop.permute.xlu2 %2820 }
 0x45d   : > { %v3768_v28 = vld [vmem:[#allocation2 + $0x50] sm:$0xff]  ;;  %v2889_v31 = vpack.i.bf16 %v3766_v27, %v3758_v44  ;;  %v1400_v10 = vsel %vm815_vm2, %v1392_v46, %v2782_v45  ;;  %v1401_v3 = vsel %vm815_vm2, %v1393_v53, %v2783_v47  ;;  %v2899_v18 = vpack.i.bf16 %v1564_v39, %v1540_v34 }
 0x45e   : > { %v2884_v33 = vpack.i.bf16 %v3768_v28, %v3760_v13  ;;  %2580 = vmatmul.msk.bf16.gmra.mxu1 %vm567_vm0, %v1826_v25  ;;  %v1409_v36 = vsel %vm1404_vm4, %v1400_v10, %v2792_v29  ;;  %2880 = vrot.lane.b32.xlu0 %v2879_v50, %s3022_s18  ;;  %v1410_v37 = vsel %vm1404_vm4, %v1401_v3, %v2793_v49  ;;  %v2788_v7 = vunpack.i.h.bf16 %v2786_v17 }
 0x45f   : > { %2890 = vrot.lane.b32.xlu1 %v2889_v31, %s3022_s18  ;;  %v1815_v38 = vpack.c.bf16 %v1410_v37, %v1409_v36  ;;  %v2787_v57 = vunpack.i.l.bf16 %v2786_v17  ;;  %v2823_v25 = vunpack.i.h.bf16 %v2821_v15 }
 0x460   : > { %2885 = vrot.lane.b32.xlu2 %v2884_v33, %s3025_s27  ;;  %v1418_v48 = vsel %vm567_vm0, %v3576_v52, %v2788_v7 }
 0x461   : > { %v1476_v40 = vpop.permute.xlu0 %1475  ;;  %2019 = vmatmul.bf16.gmra.mxu3 %v1815_v38  ;;  %v1417_v35 = vsel %vm567_vm0, %v3551_v11, %v2787_v57 }
 0x462   : > { %1494 = vst.msk [vmem:[#allocation2 + $0x61] sm:$0xff] %vm567_vm0, %v1476_v40 }
 0x463   : > { %v2811_v51 = vpop.permute.xlu1 %2810 }
 0x464   : > { %v2813_v19 = vunpack.i.h.bf16 %v2811_v51  ;;  %v2812_v42 = vunpack.i.l.bf16 %v2811_v51  ;;  %v2831_v33 = vpop.permute.xlu2 %2830 }
 0x465   : > { %v2833_v3 = vunpack.i.h.bf16 %v2831_v33  ;;  %v2832_v36 = vunpack.i.l.bf16 %v2831_v33 }
 0x466   : > { %v1402_v59 = vsel %vm815_vm2, %v1394_v22, %v2812_v42  ;;  %v1403_v30 = vsel %vm815_vm2, %v1395_v1, %v2813_v19 }
 0x467   : > { %2900 = vrot.lane.b32.xlu1 %v2899_v18, %s3025_s27 }
 0x468   : > { %2895 = vrot.lane.b32.xlu2 %v2889_v31, %s3023_s19  ;;  %v2822_v31 = vunpack.i.l.bf16 %v2821_v15 }
 0x469   : > { %v2796_v26 = vpop.permute.xlu0 %2795  ;;  %v3787_v62 = vld [vmem:[#allocation2 + $0x62] sm:$0xff] }
 0x46a   : > { %v2904_v0 = vpack.i.bf16 %v3787_v62, %v1564_v39  ;;  %v2798_v41 = vunpack.i.h.bf16 %v2796_v26  ;;  %v2797_v24 = vunpack.i.l.bf16 %v2796_v26  ;;  %v3799_v58 = vld [vmem:[#allocation2 + $0x60] sm:$0xff] }
 0x46b   : > { %v2826_v21 = vpop.permute.xlu1 %2825  ;;  %v2909_v63 = vpack.i.bf16 %v3799_v58, %v3768_v28  ;;  %v3821_v51 = vld [vmem:[#allocation2 + $0x61] sm:$0xff] }
 0x46c   : > { %2905 = vrot.lane.b32.xlu0 %v2904_v0, %s3023_s19  ;;  %v2828_v8 = vunpack.i.h.bf16 %v2826_v21  ;;  %v2827_v61 = vunpack.i.l.bf16 %v2826_v21  ;;  %v1425_v47 = vsel %vm815_vm2, %v1417_v35, %v2797_v24  ;;  %v1426_v45 = vsel %vm815_vm2, %v1418_v48, %v2798_v41  ;;  %v1568_v21 = vld [vmem:[#allocation2 + $0x92] sm:$0xff] }
 0x46e   : > { %v1411_v34 = vsel %vm1404_vm4, %v1402_v59, %v2827_v61  ;;  %v1412_v54 = vsel %vm1404_vm4, %v1403_v30, %v2828_v8  ;;  %v1560_v8 = vld [vmem:[#allocation2 + $0x91] sm:$0xff] }
 0x46f   : > { %v1818_v6 = vpack.c.bf16 %v1412_v54, %v1411_v34  ;;  %v1552_v61 = vld [vmem:[#allocation2 + $0x90] sm:$0xff]  ;;  %v1497_v54 = vld [vmem:[#allocation2] sm:$0xff] }
 0x471   : > { %v2801_v14 = vpop.permute.xlu0 %2800  ;;  %2024 = vmatmul.bf16.gmra.mxu3 %v1818_v6 }
 0x472   : > { %v2803_v16 = vunpack.i.h.bf16 %v2801_v14  ;;  %v2802_v60 = vunpack.i.l.bf16 %v2801_v14 }
 0x474   : > { %2910 = vrot.lane.b32.xlu0 %v2909_v63, %s3022_s18  ;;  %v1433_v53 = vsel %vm1404_vm4, %v1425_v47, %v2802_v60  ;;  %v1434_v52 = vsel %vm1404_vm4, %v1426_v45, %v2803_v16 }
 0x475   : > { %v1816_v46 = vpack.c.bf16 %v1434_v52, %v1433_v53 }
 0x477   : > { %2068 = vmatmul.bf16.gmra.mxu2 %v1816_v46 }
 0x479   : > { %v2816_v11 = vpop.permute.xlu0 %2815 }
 0x47a   : > { %v2818_v17 = vunpack.i.h.bf16 %v2816_v11  ;;  %v2817_v39 = vunpack.i.l.bf16 %v2816_v11 }
 0x47c   : > { %v1420_v49 = vsel %vm567_vm0, %v3610_v5, %v2818_v17  ;;  %v1419_v29 = vsel %vm567_vm0, %v3594_v9, %v2817_v39 }
 0x47d   : > { %v1427_v50 = vsel %vm815_vm2, %v1419_v29, %v2822_v31  ;;  %v1428_v10 = vsel %vm815_vm2, %v1420_v49, %v2823_v25 }
 0x47e   : > { %v1435_v40 = vsel %vm1404_vm4, %v1427_v50, %v2832_v36  ;;  %v1436_v38 = vsel %vm1404_vm4, %v1428_v10, %v2833_v3 }
 0x47f   : > { %v1819_v5 = vpack.c.bf16 %v1436_v38, %v1435_v40 }
 0x481   : > { %v1478_v37 = vpop.permute.xlu0 %1477 }
 0x482   : > { %1495 = vst.msk [vmem:[#allocation2 + $0x71] sm:$0xff] %vm567_vm0, %v1478_v37 }
 0x487   : > { %2073 = vmatmul.bf16.gmra.mxu2 %v1819_v5 }
 0x489   : > { %v1480_v9 = vpop.permute.xlu0 %1479  ;;  %v1566_v56 = vld [vmem:[#allocation2 + $0x72] sm:$0xff] }
 0x48a   : > { %v3823_v18 = vld [vmem:[#allocation2 + $0x71] sm:$0xff]  ;;  %1496 = vst.msk [vmem:[#allocation2 + $0x81] sm:$0xff] %vm567_vm0, %v1480_v9  ;;  %v1829_v12 = vpack.c.bf16 %v1566_v56, %v3787_v62  ;;  %v2929_v1 = vpack.i.bf16 %v1566_v56, %v3787_v62 }
 0x48b   : > { %v3825_v43 = vld [vmem:[#allocation2 + $0x70] sm:$0xff]  ;;  %v2919_v26 = vpack.i.bf16 %v3823_v18, %v3821_v51 }
 0x48c   : > { %v2914_v19 = vpack.i.bf16 %v3825_v43, %v3799_v58  ;;  %2581 = vmatmul.msk.bf16.gmra.mxu1 %vm567_vm0, %v1829_v12  ;;  %v3867_v12 = vpop.f32.mrf.mxu1 }
 0x48d   : > { %2920 = vrot.lane.b32.xlu1 %v2919_v26, %s3022_s18  ;;  %v2846_v11 = vpop.permute.xlu2 %2845 }
 0x48e   : > { %2915 = vrot.lane.b32.xlu2 %v2914_v19, %s3025_s27  ;;  %v2848_v39 = vunpack.i.h.bf16 %v2846_v11  ;;  %v2847_v49 = vunpack.i.l.bf16 %v2846_v11 }
 0x490   : > { %v1786_v33 = vsel %vm567_vm0, %v3730_v23, %v2848_v39  ;;  %v1785_v50 = vsel %vm567_vm0, %v3688_v2, %v2847_v49 }
 0x491   : > { %v1544_v42 = vld [vmem:[#allocation2 + $0x82] sm:$0xff] }
 0x492   : > { %v2934_v0 = vpack.i.bf16 %v1544_v42, %v1566_v56  ;;  %v1528_v22 = vld [vmem:[#allocation2 + $0x80] sm:$0xff]  ;;  %v1832_v57 = vpack.c.bf16 %v1568_v21, %v1544_v42 }
 0x493   : > { %v3840_v7 = vld [vmem:[#allocation2 + $0x81] sm:$0xff]  ;;  %v2944_v59 = vpack.i.bf16 %v1528_v22, %v3825_v43  ;;  %v2939_v41 = vpack.i.bf16 %v1552_v61, %v1528_v22  ;;  %v2958_v42 = vld [vmem:[%s4070_s8] ss:$0 sm:$0xff] }
 0x494   : > { %2935 = vrot.lane.b32.xlu0 %v2934_v0, %s3023_s19  ;;  %v2949_v30 = vpack.i.bf16 %v1560_v8, %v3840_v7 }
 0x495   : > { %2930 = vrot.lane.b32.xlu1 %v2929_v1, %s3025_s27 }
 0x496   : > { %2925 = vrot.lane.b32.xlu2 %v2919_v26, %s3023_s19 }
 0x49c   : > { %2582 = vmatmul.msk.bf16.gmra.mxu1 %vm567_vm0, %v1832_v57  ;;  %2945 = vrot.lane.b32.xlu0 %v2944_v59, %s3022_s18 }
 0x49d   : > { %2950 = vrot.lane.b32.xlu1 %v2949_v30, %s3022_s18  ;;  %v2836_v62 = vpop.permute.xlu1 %2835  ;;  %v2110_v30 = vpop.f32.mrf.mxu1 }
 0x49e   : > { %2940 = vrot.lane.b32.xlu2 %v2939_v41, %s3025_s27  ;;  %v2838_v24 = vunpack.i.h.bf16 %v2836_v62  ;;  %v2837_v34 = vunpack.i.l.bf16 %v2836_v62 }
 0x4a0   : > { %v1762_v16 = vsel %vm567_vm0, %v3695_v20, %v2838_v24  ;;  %v1761_v60 = vsel %vm567_vm0, %v1497_v54, %v2837_v34  ;;  %v2957_v20 = vld [vmem:[%s4071_s9] ss:$0 sm:$0xff] }
 0x4a2   : > { %v2856_v17 = vpop.permute.xlu2 %2855 }
 0x4a3   : > { %v2858_v29 = vunpack.i.h.bf16 %v2856_v17  ;;  %v2857_v25 = vunpack.i.l.bf16 %v2856_v17 }
 0x4a4   : > { %2197 = vrot.lane.b32.xlu0 %v2957_v20, %s3023_s19 }
 0x4a5   : > { %v2841_v6 = vpop.permute.xlu1 %2840  ;;  %v1793_v36 = vsel %vm815_vm2, %v1785_v50, %v2857_v25  ;;  %v1794_v37 = vsel %vm815_vm2, %v1786_v33, %v2858_v29 }
 0x4a6   : > { %v2843_v48 = vunpack.i.h.bf16 %v2841_v6  ;;  %v2842_v14 = vunpack.i.l.bf16 %v2841_v6  ;;  %v2851_v35 = vpop.permute.xlu0 %2850  ;;  %2183 = vrot.lane.b32.xlu2 %v2958_v42, %s3023_s19 }
 0x4a7   : > { %v2853_v63 = vunpack.i.h.bf16 %v2851_v35  ;;  %v2852_v15 = vunpack.i.l.bf16 %v2851_v35 }
 0x4a8   : > { %v1769_v47 = vsel %vm815_vm2, %v1761_v60, %v2842_v14  ;;  %v1770_v45 = vsel %vm815_vm2, %v1762_v16, %v2843_v48 }
 0x4a9   : > { %v1777_v53 = vsel %vm1404_vm4, %v1769_v47, %v2852_v15  ;;  %v1778_v52 = vsel %vm1404_vm4, %v1770_v45, %v2853_v63 }
 0x4aa   : > { %v1821_v46 = vpack.c.bf16 %v1778_v52, %v1777_v53  ;;  %v2866_v56 = vpop.permute.xlu2 %2865 }
 0x4ab   : > { %v2868_v22 = vunpack.i.h.bf16 %v2866_v56  ;;  %v2867_v8 = vunpack.i.l.bf16 %v2866_v56 }
 0x4ac   : > { %2029 = vmatmul.bf16.gmra.mxu3 %v1821_v46 }
 0x4ad   : > { %v1764_v35 = vsel %vm567_vm0, %v3726_v55, %v2868_v22  ;;  %v1763_v16 = vsel %vm567_vm0, %v3697_v4, %v2867_v8 }
 0x4b8   : > { %v2861_v31 = vpop.permute.xlu1 %2860 }
 0x4b9   : > { %v2863_v10 = vunpack.i.h.bf16 %v2861_v31  ;;  %v2862_v3 = vunpack.i.l.bf16 %v2861_v31 }
 0x4ba   : > { %v2886_v21 = vpop.permute.xlu2 %2885 }
 0x4bb   : > { %v1801_v40 = vsel %vm1404_vm4, %v1793_v36, %v2862_v3  ;;  %v1802_v38 = vsel %vm1404_vm4, %v1794_v37, %v2863_v10  ;;  %v2888_v54 = vunpack.i.h.bf16 %v2886_v21  ;;  %v2887_v6 = vunpack.i.l.bf16 %v2886_v21 }
 0x4bc   : > { %v1822_v5 = vpack.c.bf16 %v1802_v38, %v1801_v40  ;;  %v2010_v9 = vpop.f32.mrf.mxu3  ;;  %v2643_v40 = vld [vmem:[%s4072_s10 + $0x18] sm:$0xff] }
 0x4bd   : > { %2280 = vmatpush.bf16.msrb.mxu3 %v2643_v40 }
 0x4be   : > { %2078 = vmatmul.bf16.gmra.mxu2 %v1822_v5 }
 0x4c0   : > { %v2871_v2 = vpop.permute.xlu1 %2870 }
 0x4c1   : > { %v2873_v41 = vunpack.i.h.bf16 %v2871_v2  ;;  %v2872_v62 = vunpack.i.l.bf16 %v2871_v2 }
 0x4c2   : > { %v2896_v31 = vpop.permute.xlu2 %2895 }
 0x4c3   : > { %v1771_v53 = vsel %vm815_vm2, %v1763_v16, %v2872_v62  ;;  %v1772_v52 = vsel %vm815_vm2, %v1764_v35, %v2873_v41  ;;  %v2898_v3 = vunpack.i.h.bf16 %v2896_v31  ;;  %v2897_v36 = vunpack.i.l.bf16 %v2896_v31 }
 0x4c4   : > { %v2012_v61 = vpop.f32.mrf.mxu3 }
 0x4c5   : > { %v1766_v56 = vsel %vm567_vm0, %v3768_v28, %v2898_v3 }
 0x4c6   : > { %v2059_v23 = vpop.f32.mrf.mxu2 }
 0x4c7   : > { %v3869_v26 = vadd.f32 %v2059_v23, %v2010_v9  ;;  %v1765_v23 = vsel %vm567_vm0, %v3760_v13, %v2897_v36  ;;  %v2642_v13 = vld [vmem:[%s4072_s10 + $0x10] sm:$0xff] }
 0x4c8   : > { %v2876_v19 = vpop.permute.xlu0 %2875  ;;  %2281 = vmatpush.bf16.msrb.mxu3 %v2642_v13 }
 0x4c9   : > { %v2878_v0 = vunpack.i.h.bf16 %v2876_v19  ;;  %v2877_v1 = vunpack.i.l.bf16 %v2876_v19 }
 0x4cb   : > { %v1787_v24 = vsel %vm567_vm0, %v3724_v32, %v2877_v1  ;;  %v1788_v34 = vsel %vm567_vm0, %v3758_v44, %v2878_v0 }
 0x4cc   : > { %v1795_v32 = vsel %vm815_vm2, %v1787_v24, %v2887_v6  ;;  %v1796_v44 = vsel %vm815_vm2, %v1788_v34, %v2888_v54 }
 0x4cd   : > { %v2015_v39 = vpop.f32.mrf.mxu3 }
 0x4ce   : > { %v2061_v57 = vpop.f32.mrf.mxu2 }
 0x4cf   : > { %v2062_v59 = vadd.f32 %v2061_v57, %v2012_v61 }
 0x4d0   : > { %v2881_v15 = vpop.permute.xlu0 %2880 }
 0x4d1   : > { %v3879_v48 = vadd.f32 %v2110_v30, %v2062_v59  ;;  %v2891_v14 = vpop.permute.xlu1 %2890  ;;  %v2883_v47 = vunpack.i.h.bf16 %v2881_v15  ;;  %v2882_v45 = vunpack.i.l.bf16 %v2881_v15 }
 0x4d2   : > { %v2893_v60 = vunpack.i.h.bf16 %v2891_v14  ;;  %v2892_v63 = vunpack.i.l.bf16 %v2891_v14 }
 0x4d3   : > { %v1779_v11 = vsel %vm1404_vm4, %v1771_v53, %v2882_v45  ;;  %v1780_v4 = vsel %vm1404_vm4, %v1772_v52, %v2883_v47 }
 0x4d4   : > { %v1803_v46 = vsel %vm1404_vm4, %v1795_v32, %v2892_v63  ;;  %v1804_v55 = vsel %vm1404_vm4, %v1796_v44, %v2893_v60  ;;  %v1824_v20 = vpack.c.bf16 %v1780_v4, %v1779_v11 }
 0x4d5   : > { %v1825_v17 = vpack.c.bf16 %v1804_v55, %v1803_v46  ;;  %v2017_v50 = vpop.f32.mrf.mxu3 }
 0x4d6   : > { %2034 = vmatmul.bf16.gmra.mxu3 %v1824_v20 }
 0x4d7   : > { %2083 = vmatmul.bf16.gmra.mxu2 %v1825_v17 }
 0x4d9   : > { %v2901_v33 = vpop.permute.xlu1 %2900 }
 0x4da   : > { %v2064_v49 = vpop.f32.mrf.mxu2  ;;  %v2903_v38 = vunpack.i.h.bf16 %v2901_v33  ;;  %v2902_v5 = vunpack.i.l.bf16 %v2901_v33 }
 0x4db   : > { %v3893_v29 = vadd.f32 %v2064_v49, %v2015_v39 }
 0x4dc   : > { %v1773_v42 = vsel %vm815_vm2, %v1765_v23, %v2902_v5  ;;  %v1774_v0 = vsel %vm815_vm2, %v1766_v56, %v2903_v38 }
 0x4de   : > { %v2906_v25 = vpop.permute.xlu0 %2905 }
 0x4df   : > { %v2908_v59 = vunpack.i.h.bf16 %v2906_v25  ;;  %v2907_v28 = vunpack.i.l.bf16 %v2906_v25 }
 0x4e1   : > { %v1790_v54 = vsel %vm567_vm0, %v3821_v51, %v2908_v59  ;;  %v1789_v6 = vsel %vm567_vm0, %v3766_v27, %v2907_v28  ;;  %v3923_v27 = vpop.f32.mrf.mxu1  ;;  %v2641_v59 = vld [vmem:[%s4072_s10 + $0x8] sm:$0xff] }
 0x4e2   : > { %v2066_v10 = vpop.f32.mrf.mxu2  ;;  %2282 = vmatpush.bf16.msrb.mxu3 %v2641_v59 }
 0x4e3   : > { %v3895_v37 = vadd.f32 %v2066_v10, %v2017_v50 }
 0x4e4   : > { %v2020_v8 = vpop.f32.mrf.mxu3 }
 0x4e6   : > { %v2911_v9 = vpop.permute.xlu0 %2910 }
 0x4e7   : > { %v2913_v2 = vunpack.i.h.bf16 %v2911_v9  ;;  %v2912_v19 = vunpack.i.l.bf16 %v2911_v9 }
 0x4e8   : > { %v2916_v61 = vpop.permute.xlu2 %2915 }
 0x4e9   : > { %v1781_v1 = vsel %vm1404_vm4, %v1773_v42, %v2912_v19  ;;  %v1782_v21 = vsel %vm1404_vm4, %v1774_v0, %v2913_v2  ;;  %v2918_v41 = vunpack.i.h.bf16 %v2916_v61  ;;  %v2917_v62 = vunpack.i.l.bf16 %v2916_v61 }
 0x4ea   : > { %v1827_v22 = vpack.c.bf16 %v1782_v21, %v1781_v1 }
 0x4eb   : > { %v1797_v16 = vsel %vm815_vm2, %v1789_v6, %v2917_v62  ;;  %v1798_v60 = vsel %vm815_vm2, %v1790_v54, %v2918_v41  ;;  %v2640_v62 = vld [vmem:[%s4072_s10] sm:$0xff] }
 0x4ec   : > { %2039 = vmatmul.bf16.gmra.mxu3 %v1827_v22  ;;  %v2022_v24 = vpop.f32.mrf.mxu3 }
 0x4ed   : > { %2283 = vmatpush.bf16.msrb.mxu3 %v2640_v62 }
 0x4f0   : > { %v2926_v47 = vpop.permute.xlu2 %2925 }
 0x4f1   : > { %v2928_v46 = vunpack.i.h.bf16 %v2926_v47  ;;  %v2927_v55 = vunpack.i.l.bf16 %v2926_v47 }
 0x4f3   : > { %v1768_v31 = vsel %vm567_vm0, %v3825_v43, %v2928_v46  ;;  %v1767_v33 = vsel %vm567_vm0, %v3799_v58, %v2927_v55 }
 0x4f4   : > { %v2025_v52 = vpop.f32.mrf.mxu3 }
 0x4f8   : > { %v2941_v39 = vpop.permute.xlu2 %2940 }
 0x4f9   : > { %v2943_v36 = vunpack.i.h.bf16 %v2941_v39  ;;  %v2942_v40 = vunpack.i.l.bf16 %v2941_v39 }
 0x4fa   : > { %v2069_v57 = vpop.f32.mrf.mxu2 }
 0x4fb   : > { %v3908_v30 = vadd.f32 %v2069_v57, %v2020_v8  ;;  %v2115_v8 = vpop.f32.mrf.mxu1 }
 0x4fc   : > { %v2027_v42 = vpop.f32.mrf.mxu3 }
 0x4ff   : > { %v2921_v34 = vpop.permute.xlu1 %2920 }
 0x500   : > { %v2923_v14 = vunpack.i.h.bf16 %v2921_v34  ;;  %v2922_v35 = vunpack.i.l.bf16 %v2921_v34 }
 0x502   : > { %v1805_v63 = vsel %vm1404_vm4, %v1797_v16, %v2922_v35  ;;  %v1806_v15 = vsel %vm1404_vm4, %v1798_v60, %v2923_v14  ;;  %v2071_v45 = vpop.f32.mrf.mxu2  ;;  %v3959_v16 = vpop.permute.xlu2 %2183  ;;  %v2109_v60 = vadd.f32 %v3867_v12, %v3869_v26 }
 0x503   : > { %v1828_v32 = vpack.c.bf16 %v1806_v15, %v1805_v63  ;;  %v3921_v44 = vadd.f32 %v2071_v45, %v2022_v24  ;;  %v3948_v28 = vpop.f32.mrf.mxu1  ;;  %v3966_v63 = vld [vmem:[%s4068_s6] ss:$0 sm:$0xff] }
 0x504   : > { %v2153_v12 = vmul.f32 %v3966_v63, %v3879_v48 }
 0x505   : > { %2088 = vmatmul.bf16.gmra.mxu2 %v1828_v32 }
 0x506   : > { %v2936_v51 = vpop.permute.xlu0 %2935 }
 0x507   : > { %v2931_v53 = vpop.permute.xlu1 %2930  ;;  %v2938_v11 = vunpack.i.h.bf16 %v2936_v51  ;;  %v2937_v4 = vunpack.i.l.bf16 %v2936_v51  ;;  %v2152_v51 = vmul.f32 %v3966_v63, %v2109_v60 }
 0x508   : > { %v2933_v49 = vunpack.i.h.bf16 %v2931_v53  ;;  %v2932_v25 = vunpack.i.l.bf16 %v2931_v53  ;;  %v3975_v53 = vld [vmem:[%s4069_s7] ss:$0 sm:$0xff] }
 0x509   : > { %v1792_v50 = vsel %vm567_vm0, %v3840_v7, %v2938_v11  ;;  %v1791_v10 = vsel %vm567_vm0, %v3823_v18, %v2937_v4  ;;  %v2164_v11 = vadd.f32 %v3975_v53, %v2152_v51  ;;  %v2165_v4 = vadd.f32 %v3975_v53, %v2153_v12 }
 0x50a   : > { %v2074_v17 = vpop.f32.mrf.mxu2  ;;  %v1775_v2 = vsel %vm815_vm2, %v1767_v33, %v2932_v25  ;;  %v1776_v43 = vsel %vm815_vm2, %v1768_v31, %v2933_v49  ;;  %v1799_v7 = vsel %vm815_vm2, %v1791_v10, %v2942_v40  ;;  %v1800_v18 = vsel %vm815_vm2, %v1792_v50, %v2943_v36 }
 0x50b   : > { %v3925_v20 = vadd.f32 %v2074_v17, %v2025_v52  ;;  %v3950_v13 = vpop.f32.mrf.mxu1  ;;  %v2172_v25 = vmax.f32 %v2164_v11, 0.0  ;;  %v2173_v31 = vmax.f32 %v2165_v4, 0.0 }
 0x50e   : > { %v2946_v3 = vpop.permute.xlu0 %2945 }
 0x50f   : > { %v2948_v38 = vunpack.i.h.bf16 %v2946_v3  ;;  %v2947_v5 = vunpack.i.l.bf16 %v2946_v3  ;;  %v2951_v9 = vpop.permute.xlu1 %2950 }
 0x510   : > { %v2953_v56 = vunpack.i.h.bf16 %v2951_v9  ;;  %v2952_v23 = vunpack.i.l.bf16 %v2951_v9  ;;  %v2114_v9 = vadd.f32 %v3923_v27, %v3893_v29 }
 0x511   : > { %v1783_v58 = vsel %vm1404_vm4, %v1775_v2, %v2947_v5  ;;  %v1784_v19 = vsel %vm1404_vm4, %v1776_v43, %v2948_v38 }
 0x512   : > { %v2076_v0 = vpop.f32.mrf.mxu2  ;;  %v1830_v1 = vpack.c.bf16 %v1784_v19, %v1783_v58  ;;  %v1807_v21 = vsel %vm1404_vm4, %v1799_v7, %v2952_v23  ;;  %v1808_v22 = vsel %vm1404_vm4, %v1800_v18, %v2953_v56  ;;  %v2116_v56 = vadd.f32 %v2115_v8, %v3895_v37 }
 0x513   : > { %v3943_v61 = vadd.f32 %v2076_v0, %v2027_v42  ;;  %v1831_v57 = vpack.c.bf16 %v1808_v22, %v1807_v21  ;;  %v3952_v41 = vpop.f32.mrf.mxu1  ;;  %v2154_v58 = vmul.f32 %v3966_v63, %v2114_v9 }
 0x514   : > { %2044 = vmatmul.bf16.gmra.mxu3 %v1830_v1  ;;  %v2155_v19 = vmul.f32 %v3966_v63, %v2116_v56  ;;  %v2124_v9 = vadd.f32 %v3952_v41, %v3925_v20 }
 0x515   : > { %2093 = vmatmul.bf16.gmra.mxu2 %v1831_v57  ;;  %v2166_v1 = vadd.f32 %v3975_v53, %v2154_v58 }
 0x516   : > { %v3968_v15 = vpop.permute.xlu0 %2197  ;;  %v2167_v21 = vadd.f32 %v3975_v53, %v2155_v19  ;;  %v2158_v58 = vmul.f32 %v3966_v63, %v2124_v9 }
 0x517   : > { %v2174_v22 = vmax.f32 %v2166_v1, 0.0 }
 0x518   : > { %v2175_v8 = vmax.f32 %v2167_v21, 0.0  ;;  %v2170_v20 = vadd.f32 %v3975_v53, %v2158_v58 }
 0x51a   : > { %v2178_v21 = vmax.f32 %v2170_v20, 0.0 }
 0x51b   : > { %v3957_v24 = vpop.f32.mrf.mxu1 }
 0x51c   : > { %v2126_v56 = vadd.f32 %v3957_v24, %v3943_v61 }
 0x51e   : > { %v2159_v19 = vmul.f32 %v3966_v63, %v2126_v56 }
 0x520   : > { %v2171_v41 = vadd.f32 %v3975_v53, %v2159_v19 }
 0x523   : > { %v2128_v54 = vpop.f32.mrf.mxu1 }
 0x52b   : > { %v2130_v52 = vpop.f32.mrf.mxu1 }
 0x52f   : > { %v2030_v34 = vpop.f32.mrf.mxu3 }
 0x533   : > { %v2133_v36 = vpop.f32.mrf.mxu1 }
 0x537   : > { %v2032_v45 = vpop.f32.mrf.mxu3 }
 0x53b   : > { %v2135_v18 = vpop.f32.mrf.mxu1 }
 0x541   : > { %v2079_v6 = vpop.f32.mrf.mxu2 }
 0x542   : > { %v2080_v14 = vadd.f32 %v2079_v6, %v2030_v34 }
 0x543   : > { %v2138_v6 = vpop.f32.mrf.mxu1 }
 0x544   : > { %v2129_v35 = vadd.f32 %v2128_v54, %v2080_v14  ;;  %v2645_v54 = vld [vmem:[%s4074_s12 + $0x8] sm:$0xff] }
 0x545   : > { %2347 = vmatpush.bf16.msra.mxu2 %v2645_v54 }
 0x546   : > { %v2186_v47 = vmul.f32 %v3959_v16, %v2129_v35 }
 0x548   : > { %v2200_v55 = vadd.f32 %v3968_v15, %v2186_v47 }
 0x549   : > { %v2081_v32 = vpop.f32.mrf.mxu2 }
 0x54a   : > { %v2082_v26 = vadd.f32 %v2081_v32, %v2032_v45  ;;  %v2208_v49 = vmax.f32 %v2200_v55, 0.0  ;;  %v2119_v45 = vadd.f32 %v3948_v28, %v3908_v30  ;;  %v2121_v32 = vadd.f32 %v3950_v13, %v3921_v44 }
 0x54b   : > { %v2140_v51 = vpop.f32.mrf.mxu1 }
 0x54c   : > { %v2131_v46 = vadd.f32 %v2130_v52, %v2082_v26  ;;  %v2216_v50 = vsel %vm567_vm0, %v2172_v25, %v2208_v49  ;;  %v2644_v26 = vld [vmem:[%s4074_s12] sm:$0xff]  ;;  %v2156_v55 = vmul.f32 %v3966_v63, %v2119_v45  ;;  %v2157_v11 = vmul.f32 %v3966_v63, %v2121_v32 }
 0x54d   : > { %2348 = vmatpush.bf16.msra.mxu2 %v2644_v26 }
 0x54e   : > { %v2187_v17 = vmul.f32 %v3959_v16, %v2131_v46  ;;  %v2168_v44 = vadd.f32 %v3975_v53, %v2156_v55  ;;  %v2169_v13 = vadd.f32 %v3975_v53, %v2157_v11  ;;  %v2959_v53 = vld [vmem:[%s4073_s11] ss:$0 sm:$0xff] }
 0x54f   : > { %v2960_v55 = vld [vmem:[%s4075_s13] ss:$0 sm:$0xff] }
 0x550   : > { %v2201_v39 = vadd.f32 %v3968_v15, %v2187_v17 }
 0x552   : > { %v2209_v33 = vmax.f32 %v2201_v39, 0.0 }
 0x554   : > { %v2217_v48 = vsel %vm567_vm0, %v2173_v31, %v2209_v33  ;;  %v2176_v31 = vmax.f32 %v2168_v44, 0.0  ;;  %v2177_v33 = vmax.f32 %v2169_v13, 0.0 }
 0x555   : > { %v2224_v10 = vpack.c.bf16 %v2217_v48, %v2216_v50  ;;  %v2143_v50 = vpop.f32.mrf.mxu1 }
 0x557   : > { %2599 = vmatmul.msk.bf16.vlgmr.msrb.gmra.mxu3 %vm815_vm2, %v2224_v10 }
 0x559   : > { %v2035_v40 = vpop.f32.mrf.mxu3 }
 0x55a   : > { %v2084_v3 = vpop.f32.mrf.mxu2 }
 0x55b   : > { %v2085_v38 = vadd.f32 %v2084_v3, %v2035_v40 }
 0x55d   : > { %v2134_v5 = vadd.f32 %v2133_v36, %v2085_v38 }
 0x55f   : > { %v2188_v23 = vmul.f32 %v3959_v16, %v2134_v5 }
 0x561   : > { %v2037_v43 = vpop.f32.mrf.mxu3  ;;  %v2202_v42 = vadd.f32 %v3968_v15, %v2188_v23 }
 0x562   : > { %v2086_v2 = vpop.f32.mrf.mxu2 }
 0x563   : > { %v2087_v7 = vadd.f32 %v2086_v2, %v2037_v43  ;;  %v2210_v37 = vmax.f32 %v2202_v42, 0.0 }
 0x565   : > { %v2136_v0 = vadd.f32 %v2135_v18, %v2087_v7  ;;  %v2218_v59 = vsel %vm567_vm0, %v2174_v22, %v2210_v37  ;;  %v2145_v18 = vpop.f32.mrf.mxu1 }
 0x567   : > { %v2189_v29 = vmul.f32 %v3959_v16, %v2136_v0 }
 0x569   : > { %v2203_v27 = vadd.f32 %v3968_v15, %v2189_v29  ;;  %v2179_v29 = vmax.f32 %v2171_v41, 0.0 }
 0x56b   : > { %v2211_v57 = vmax.f32 %v2203_v27, 0.0 }
 0x56d   : > { %v2219_v62 = vsel %vm567_vm0, %v2175_v8, %v2211_v57 }
 0x56e   : > { %v2225_v34 = vpack.c.bf16 %v2219_v62, %v2218_v59 }
 0x56f   : > { %v2040_v14 = vpop.f32.mrf.mxu3 }
 0x570   : > { %2600 = vmatmul.msk.bf16.gmra.mxu3 %vm815_vm2, %v2225_v34 }
 0x577   : > { %v2042_v52 = vpop.f32.mrf.mxu3 }
 0x588   : > { %v2089_v35 = vpop.f32.mrf.mxu2 }
 0x589   : > { %v2090_v60 = vadd.f32 %v2089_v35, %v2040_v14 }
 0x58b   : > { %v2139_v47 = vadd.f32 %v2138_v6, %v2090_v60 }
 0x58d   : > { %v2190_v12 = vmul.f32 %v3959_v16, %v2139_v47 }
 0x58f   : > { %v2204_v30 = vadd.f32 %v3968_v15, %v2190_v12 }
 0x590   : > { %v2091_v46 = vpop.f32.mrf.mxu2 }
 0x591   : > { %v2092_v4 = vadd.f32 %v2091_v46, %v2042_v52  ;;  %v2212_v39 = vmax.f32 %v2204_v30, 0.0 }
 0x593   : > { %v2141_v28 = vadd.f32 %v2140_v51, %v2092_v4  ;;  %v2220_v36 = vsel %vm567_vm0, %v2176_v31, %v2212_v39 }
 0x595   : > { %v2191_v17 = vmul.f32 %v3959_v16, %v2141_v28 }
 0x597   : > { %v2205_v49 = vadd.f32 %v3968_v15, %v2191_v17  ;;  %v2045_v25 = vpop.f32.mrf.mxu3 }
 0x598   : > { %v2094_v10 = vpop.f32.mrf.mxu2 }
 0x599   : > { %v2213_v48 = vmax.f32 %v2205_v49, 0.0  ;;  %v2095_v3 = vadd.f32 %v2094_v10, %v2045_v25 }
 0x59b   : > { %v2221_v40 = vsel %vm567_vm0, %v2177_v33, %v2213_v48  ;;  %v2144_v38 = vadd.f32 %v2143_v50, %v2095_v3 }
 0x59c   : > { %v2226_v5 = vpack.c.bf16 %v2221_v40, %v2220_v36 }
 0x59d   : > { %v2192_v23 = vmul.f32 %v3959_v16, %v2144_v38 }
 0x59e   : > { %2601 = vmatmul.msk.bf16.gmra.mxu3 %vm815_vm2, %v2226_v5 }
 0x59f   : > { %v2047_v2 = vpop.f32.mrf.mxu3  ;;  %v2206_v42 = vadd.f32 %v3968_v15, %v2192_v23 }
 0x5a0   : > { %v2096_v43 = vpop.f32.mrf.mxu2 }
 0x5a1   : > { %v2097_v7 = vadd.f32 %v2096_v43, %v2047_v2  ;;  %v2214_v24 = vmax.f32 %v2206_v42, 0.0 }
 0x5a3   : > { %v2146_v0 = vadd.f32 %v2145_v18, %v2097_v7  ;;  %v2222_v27 = vsel %vm567_vm0, %v2178_v21, %v2214_v24 }
 0x5a5   : > { %v2193_v61 = vmul.f32 %v3959_v16, %v2146_v0 }
 0x5a7   : > { %v2207_v1 = vadd.f32 %v3968_v15, %v2193_v61 }
 0x5a9   : > { %v2215_v37 = vmax.f32 %v2207_v1, 0.0 }
 0x5ab   : > { %v2223_v63 = vsel %vm567_vm0, %v2179_v29, %v2215_v37 }
 0x5ac   : > { %v2227_v22 = vpack.c.bf16 %v2223_v63, %v2222_v27 }
 0x5ae   : > { %2602 = vmatmul.msk.bf16.gmra.mxu3 %vm815_vm2, %v2227_v22 }
 0x5da   : > { %v2285_v8 = vpop.f32.mrf.mxu3 }
 0x5db   : > { %v2286_v16 = vadd.f32 %v2959_v53, %v2285_v8 }
 0x5e2   : > { %v2287_v57 = vpop.f32.mrf.mxu3 }
 0x5e3   : > { %v2288_v59 = vadd.f32 %v2959_v53, %v2287_v57 }
 0x5e5   : > { %v2305_v62 = vpack.c.bf16 %v2288_v59, %v2286_v16 }
 0x5e7   : > { %2611 = vmatmul.msk.bf16.vlgmr.msra.gmra.mxu2 %vm567_vm0, %v2305_v62 }
 0x5f3   : > { %v2290_v15 = vpop.f32.mrf.mxu3 }
 0x5f4   : > { %v2291_v54 = vadd.f32 %v2959_v53, %v2290_v15 }
 0x5fb   : > { %v2292_v34 = vpop.f32.mrf.mxu3 }
 0x5fc   : > { %v2293_v6 = vadd.f32 %v2959_v53, %v2292_v34 }
 0x5fe   : > { %v2306_v14 = vpack.c.bf16 %v2293_v6, %v2291_v54 }
 0x600   : > { %2612 = vmatmul.msk.bf16.gmra.mxu2 %vm567_vm0, %v2306_v14 }
 0x621   : > { %v2295_v35 = vpop.f32.mrf.mxu3 }
 0x622   : > { %v2296_v47 = vadd.f32 %v2959_v53, %v2295_v35 }
 0x629   : > { %v2297_v60 = vpop.f32.mrf.mxu3 }
 0x62a   : > { %v2298_v45 = vadd.f32 %v2959_v53, %v2297_v60 }
 0x62c   : > { %v2307_v32 = vpack.c.bf16 %v2298_v45, %v2296_v47 }
 0x62e   : > { %2613 = vmatmul.msk.bf16.gmra.mxu2 %vm567_vm0, %v2307_v32 }
 0x631   : > { %v2300_v51 = vpop.f32.mrf.mxu3 }
 0x632   : > { %v2301_v26 = vadd.f32 %v2959_v53, %v2300_v51 }
 0x639   : > { %v2302_v12 = vpop.f32.mrf.mxu3 }
 0x63a   : > { %v2303_v52 = vadd.f32 %v2959_v53, %v2302_v12 }
 0x63c   : > { %v2308_v46 = vpack.c.bf16 %v2303_v52, %v2301_v26 }
 0x63e   : > { %2614 = vmatmul.msk.bf16.gmra.mxu2 %vm567_vm0, %v2308_v46 }
 0x66a   : > { %v2350_v11 = vpop.f32.mrf.mxu2 }
 0x66b   : > { %v2351_v4 = vadd.f32 %v2960_v55, %v2350_v11 }
 0x66d   : > { %2370 = vst.msk [vmem:[%s501_s24] sm:$0xff] %vm567_vm0, %v2351_v4 }
 0x672   : > { %v2352_v30 = vpop.f32.mrf.mxu2 }
 0x673   : > { %v2353_v28 = vadd.f32 %v2960_v55, %v2352_v30 }
 0x675   : > { %2371 = vst.msk [vmem:[%s501_s24 + $0x8] sm:$0xff] %vm567_vm0, %v2353_v28 }
 0x683   : > { %v2355_v44 = vpop.f32.mrf.mxu2 }
 0x684   : > { %v2356_v13 = vadd.f32 %v2960_v55, %v2355_v44 }
 0x686   : > { %2372 = vst.msk [vmem:[%s501_s24 + $0x10] sm:$0xff] %vm567_vm0, %v2356_v13 }
 0x68b   : > { %v2357_v17 = vpop.f32.mrf.mxu2 }
 0x68c   : > { %v2358_v39 = vadd.f32 %v2960_v55, %v2357_v17 }
 0x68e   : > { %2373 = vst.msk [vmem:[%s501_s24 + $0x18] sm:$0xff] %vm567_vm0, %v2358_v39 }
 0x6b1   : > { %v2360_v49 = vpop.f32.mrf.mxu2 }
 0x6b2   : > { %v2361_v25 = vadd.f32 %v2960_v55, %v2360_v49 }
 0x6b4   : > { %2374 = vst.msk [vmem:[%s501_s24 + $0x20] sm:$0xff] %vm567_vm0, %v2361_v25 }
 0x6b9   : > { %v2362_v31 = vpop.f32.mrf.mxu2 }
 0x6ba   : > { %v2363_v33 = vadd.f32 %v2960_v55, %v2362_v31 }
 0x6bc   : > { %2375 = vst.msk [vmem:[%s501_s24 + $0x28] sm:$0xff] %vm567_vm0, %v2363_v33 }
 0x6c1   : > { %v2365_v50 = vpop.f32.mrf.mxu2 }
 0x6c2   : > { %v2366_v48 = vadd.f32 %v2960_v55, %v2365_v50 }
 0x6c4   : > { %2376 = vst.msk [vmem:[%s501_s24 + $0x30] sm:$0xff] %vm567_vm0, %v2366_v48 }
 0x6c9   : > { %v2367_v10 = vpop.f32.mrf.mxu2 }
 0x6ca   : > { %v2368_v3 = vadd.f32 %v2960_v55, %v2367_v10 }
 0x6cc   : > { %2377 = vst.msk [vmem:[%s501_s24 + $0x38] sm:$0xff] %vm567_vm0, %v2368_v3 }
 0x6cd PF: > { %s25_s29 = sadd.s32 1, %s3018_s29  }
 0x6ce   : > { %p22_p7 = scmp.ge.s32.totalorder %s25_s29, 4  }
 0x6d0   :  { %24 = sbr.rel (!%p22_p7) target bundleno = 1 (0x1), region = 116 }
 0x6d5   :  { %2399 = vsyncpa [#allocation4], 1 }
 0x6d6   :  { %2401 = vsyncpa [#allocation4 + $0x1], 1 }

</bundles_post_ra>
